<compile_context>
chip_gen: v6e
topology: v6e:2x2x1
jax: 0.10.0
libtpu: 0.0.40
codegen_flags: <defaults>
</compile_context>

<pallas_src>
import jax
import jax.numpy as jnp
import numpy as np
from jax.experimental import pallas as pl
from jax.experimental.pallas import tpu as pltpu

_F32 = jnp.float32


def _round_up(x, m):
    return ((x + m - 1) // m) * m


def _itemsize(dt):
    return np.dtype(dt).itemsize


def _vmem_physical_bytes():
    try:
        info = pltpu.get_tpu_info()
        v = getattr(info, "vmem_capacity_bytes", None)
        if v:
            return int(v)
    except Exception:
        pass
    return 64 * 1024 * 1024  # conservative: v7x per-TensorCore VMEM


def _vmem_limit(resident_bytes, stream_bytes, phys):
    ws = resident_bytes + stream_bytes
    cap = (phys * 3) // 4                       # never the full physical VMEM
    return min(cap, max(32 << 20, int(ws * 1.3) + (2 << 20)))


# --------------------------------------------------------------------------
# One-time parameter / conditioning preparation (hoisted out of the forward).
# --------------------------------------------------------------------------
def prepare_siren_params(weight, bias, *, dtype=jnp.float32, in_pad_to=None):
    """Pre-transpose W to (in, out), zero-pad the output/lane dim to a
    multiple of 128 (full-width unmasked stores, end-to-end padded layout),
    optionally zero-pad the input rows to `in_pad_to` so this layer consumes
    the previous layer's padded activations directly, and (if dtype=bf16)
    hoist the matmul-input cast out of the per-step forward."""
    weight = jnp.asarray(weight, _F32)
    bias = jnp.asarray(bias, _F32)
    out_f, in_f = weight.shape
    in_rows = in_f if in_pad_to is None else int(in_pad_to)
    assert in_rows >= in_f
    out_f_pad = _round_up(out_f, 128)
    wt = jnp.zeros((in_rows, out_f_pad), dtype).at[:in_f, :out_f].set(
        weight.T.astype(dtype))
    b2 = jnp.zeros((1, out_f_pad), _F32).at[:, :out_f].set(bias)
    return wt, b2, out_f


def _canonicalize_cond(c, n_rows, out_f, out_f_pad, name):
    """Dispatch a conditioning tensor by *explicit shape* (PyTorch broadcast
    semantics) into a canonical 2-D (rows, lanes) layout with rows in {1, N}
    and lanes in {1, out_f_pad}."""
    c = jnp.asarray(c, _F32)
    if c.ndim == 0:
        c = c.reshape(1, 1)
    elif c.ndim == 1:
        if c.shape[0] in (out_f, out_f_pad):
            c = c.reshape(1, c.shape[0])                 # per-feature row
        elif c.shape[0] == 1:
            c = c.reshape(1, 1)
        else:
            raise ValueError(
                f"{name}: 1-D cond of length {c.shape[0]} is not broadcastable "
                f"against (N={n_rows}, out_f={out_f}); use shape (N, 1) for a "
                "per-row scalar.")
    elif c.ndim == 2:
        r, l = c.shape
        if r not in (1, n_rows) or l not in (1, out_f, out_f_pad):
            raise ValueError(
                f"{name}: cond shape {c.shape} is not broadcastable against "
                f"(N={n_rows}, out_f={out_f}).")
    else:
        raise ValueError(f"{name}: cond must be <= 2-D, got shape {c.shape}")
    rows_streamed = (c.shape[0] == n_rows) and n_rows != 1
    if c.shape[1] == out_f and out_f != out_f_pad:
        # Fallback per-call lane pad.  For per-row conds prefer
        # prepare_siren_cond() so this pass is hoisted out of the hot loop.
        c = jnp.pad(c, ((0, 0), (0, out_f_pad - out_f)))
    lanes_tiled = c.shape[1] == out_f_pad
    return c, rows_streamed, lanes_tiled


def prepare_siren_cond(cond, n_rows, out_f):
    """One-time cond prep: canonicalize + zero-pad lanes into the padded
    (multiple-of-128) layout so the forward pass does no per-call padding."""
    out_f_pad = _round_up(out_f, 128)
    c, _, _ = _canonicalize_cond(cond, n_rows, out_f, out_f_pad, "cond")
    return c


# --------------------------------------------------------------------------
# Tiling helpers.
# --------------------------------------------------------------------------
def _fit_tm(tm_req, n_rows, stream_bytes_per_row, resident_bytes, budget,
            other_programs=1):
    """Row tile: multiple of 8, large by default, shrunk to the VMEM budget,
    and small enough that the grid has >= 2 programs when possible (v7x has
    2 TensorCores sharded over 'parallel' grid axes)."""
    tm = max(8, min(_round_up(tm_req, 8), _round_up(n_rows, 8)))
    if other_programs * pl.cdiv(n_rows, tm) < 2 and n_rows > 8:
        tm = _round_up(pl.cdiv(n_rows, 2), 8)
    while tm > 8 and resident_bytes + 2 * tm * stream_bytes_per_row > budget:
        tm = max(8, _round_up(tm // 2, 8))
    return tm


def _cond_block_spec(rows_streamed, lanes_tiled, tm, tn, row, col):
    block = (tm if rows_streamed else 1, tn if lanes_tiled else 1)

    def index_map(a, b):
        return (row(a, b) if rows_streamed else 0,
                col(a, b) if lanes_tiled else 0)

    return pl.BlockSpec(block, index_map)


def _cond_block_spec_1d(rows_streamed, tm, lanes):
    block = (tm if rows_streamed else 1, lanes)

    def index_map(i):
        return (i if rows_streamed else 0, 0)

    return pl.BlockSpec(block, index_map)


# --------------------------------------------------------------------------
# Single SirenLayer.
# --------------------------------------------------------------------------
def _make_siren_kernel(w0, is_last, has_freq, has_phase):
    def kernel(*refs):
        i = 0
        x_ref = refs[i]; i += 1
        wt_ref = refs[i]; i += 1
        b_ref = refs[i]; i += 1
        f_ref = p_ref = None
        if has_freq:
            f_ref = refs[i]; i += 1
        if has_phase:
            p_ref = refs[i]; i += 1
        o_ref = refs[i]

        x = x_ref[...]
        w = wt_ref[...]
        if x.dtype != w.dtype:
            x = x.astype(w.dtype)        # in-VMEM cast: no extra HBM pass
        y = jnp.dot(x, w, preferred_element_type=jnp.float32)
        y = y + b_ref[...]
        if has_freq:
            y = f_ref[...] * y           # (1,tn)/(tm,1)/(tm,tn) broadcast
        if has_phase:
            y = y + p_ref[...]
        if not is_last:
            y = jnp.sin(w0 * y)          # f32 epilogue; free filler under DMA
        o_ref[...] = y.astype(o_ref.dtype)

    return kernel


def siren_layer_forward(x, wt, b2, out_f, cond_freq=None, cond_phase=None, *,
                        w0=30.0, is_last=False, tm=512, out_dtype=jnp.float32,
                        slice_output=True):
    """x: (N, in_fw) with in_fw == wt.shape[0]; wt/b2/out_f from
    prepare_siren_params().  Returns (N, out_f) if slice_output else the
    padded (N, out_f_pad) layout (padded lanes are exactly zero) for chaining
    into the next prepared layer with no intermediate copies."""
    x = jnp.asarray(x)
    if x.dtype not in (jnp.float32, jnp.bfloat16):
        x = x.astype(_F32)
    N, in_fw = x.shape
    in_w, out_f_pad = wt.shape
    assert in_fw == in_w, "x feature dim must match prepared weight rows"

    phys = _vmem_physical_bytes()
    budget = phys // 2

    # Column tile: largest 128-multiple divisor of out_f_pad whose W^T tile
    # fits the budget — J == 1 keeps W^T resident across all row tiles.
    w_bytes = _itemsize(wt.dtype)
    tn = 128
    for cand in range(out_f_pad, 127, -128):
        if out_f_pad % cand == 0 and 2 * in_w * cand * w_bytes <= budget // 2:
            tn = cand
            break
    J = out_f_pad // tn

    conds = []
    if cond_freq is not None:
        conds.append(_canonicalize_cond(cond_freq, N, out_f, out_f_pad,
                                        "cond_freq"))
    if cond_phase is not None:
        conds.append(_canonicalize_cond(cond_phase, N, out_f, out_f_pad,
                                        "cond_phase"))

    x_bytes = _itemsize(x.dtype)
    out_bytes = _itemsize(out_dtype)
    resident = 2 * (in_w * tn * w_bytes + tn * 4)          # W^T tile + bias
    stream_per_row = in_fw * x_bytes + tn * out_bytes
    for c, rows_streamed, lanes_tiled in conds:
        lanes = tn if lanes_tiled else 1
        if rows_streamed:
            stream_per_row += lanes * 4
        else:
            resident += 2 * lanes * 4

    tm = _fit_tm(tm, N, stream_per_row, resident, budget, other_programs=J)
    I = pl.cdiv(N, tm)

    # Grid order: rows outer when W^T is fully resident (J == 1); columns
    # outer when J > 1 so W^T is fetched J times total and the batch streams
    # underneath it.
    cols_outer = J > 1
    if cols_outer:
        grid = (J, I)
        row = lambda a, b: b
        col = lambda a, b: a
    else:
        grid = (I, J)
        row = lambda a, b: a
        col = lambda a, b: b

    in_specs = [
        pl.BlockSpec((tm, in_fw), lambda a, b: (row(a, b), 0)),
        pl.BlockSpec((in_w, tn), lambda a, b: (0, col(a, b))),
        pl.BlockSpec((1, tn), lambda a, b: (0, col(a, b))),
    ]
    operands = [x, wt, b2]
    for c, rows_streamed, lanes_tiled in conds:
        in_specs.append(_cond_block_spec(rows_streamed, lanes_tiled,
                                         tm, tn, row, col))
        operands.append(c)

    kernel = _make_siren_kernel(float(w0), bool(is_last),
                                cond_freq is not None, cond_phase is not None)

    out = pl.pallas_call(
        kernel,
        out_shape=jax.ShapeDtypeStruct((N, out_f_pad), out_dtype),
        grid_spec=pltpu.PrefetchScalarGridSpec(
            num_scalar_prefetch=0,
            grid=grid,
            in_specs=in_specs,
            out_specs=pl.BlockSpec((tm, tn),
                                   lambda a, b: (row(a, b), col(a, b))),
        ),
        compiler_params=pltpu.CompilerParams(
            dimension_semantics=("parallel", "parallel"),
            vmem_limit_bytes=_vmem_limit(resident, 2 * tm * stream_per_row,
                                         phys),
        ),
    )(*operands)

    return out[:, :out_f] if slice_output else out


# --------------------------------------------------------------------------
# Fused multi-layer SIREN stack (one pallas_call, no activation round-trips).
# --------------------------------------------------------------------------
def _make_siren_stack_kernel(layer_statics):
    """layer_statics: tuple of (w0, is_last, has_freq, has_phase)."""
    def kernel(*refs):
        i = 0
        x_ref = refs[i]; i += 1
        per_layer = []
        for (_, _, has_f, has_p) in layer_statics:
            w = refs[i]; i += 1
            b = refs[i]; i += 1
            f = p = None
            if has_f:
                f = refs[i]; i += 1
            if has_p:
                p = refs[i]; i += 1
            per_layer.append((w, b, f, p))
        o_ref = refs[i]

        h = x_ref[...]
        for (w0, is_last, _, _), (w_ref, b_ref, f_ref, p_ref) in zip(
                layer_statics, per_layer):
            w = w_ref[...]
            lhs = h.astype(w.dtype) if h.dtype != w.dtype else h
            y = jnp.dot(lhs, w, preferred_element_type=jnp.float32) + b_ref[...]
            if f_ref is not None:
                y = f_ref[...] * y
            if p_ref is not None:
                y = y + p_ref[...]
            h = y if is_last else jnp.sin(w0 * y)
        o_ref[...] = h.astype(o_ref.dtype)

    return kernel


def siren_stack_forward(x, layers, *, tm=512, out_dtype=jnp.float32,
                        slice_output=True):
    """Fused forward over a list of prepared SIREN layers.

    layers: sequence of dicts {"wt", "b2", "out_f", "w0", "is_last",
    "cond_freq" (opt), "cond_phase" (opt)} where layer l's wt must be
    prepared with in_pad_to = layer (l-1)'s padded width (wt.shape[1]).
    Each row tile streams in once; W^T / bias / per-feature conds stay
    resident in VMEM; intermediate activations never leave VMEM."""
    x = jnp.asarray(x)
    if x.dtype not in (jnp.float32, jnp.bfloat16):
        x = x.astype(_F32)
    N, in_fw = x.shape

    phys = _vmem_physical_bytes()
    budget = phys // 2

    statics, plan = [], []
    resident = 0
    stream_per_row = in_fw * _itemsize(x.dtype)

    prev_width = in_fw
    for li, layer in enumerate(layers):
        wt, b2, out_f = layer["wt"], layer["b2"], layer["out_f"]
        in_w, out_pad = wt.shape
        if in_w != prev_width:
            raise ValueError(
                f"layer {li}: wt has {in_w} input rows but the previous layer "
                f"produces {prev_width}; prepare with in_pad_to=...")
        w0 = float(layer.get("w0", 30.0))
        is_last = bool(layer.get("is_last", li == len(layers) - 1))
        conds = []
        for key in ("cond_freq", "cond_phase"):
            c = layer.get(key)
            conds.append(None if c is None
                         else _canonicalize_cond(c, N, out_f, out_pad, key))
        statics.append((w0, is_last, conds[0] is not None,
                        conds[1] is not None))
        resident += 2 * (in_w * out_pad * _itemsize(wt.dtype) + out_pad * 4)
        for c in conds:
            if c is None:
                continue
            arr, rows_streamed, _ = c
            if rows_streamed:
                stream_per_row += arr.shape[1] * 4
            else:
                resident += 2 * arr.shape[1] * 4
        plan.append((wt, b2, out_pad, conds))
        prev_width = out_pad

    last_out_f = layers[-1]["out_f"]
    last_pad = plan[-1][2]
    stream_per_row += last_pad * _itemsize(out_dtype)

    tm = _fit_tm(tm, N, stream_per_row, resident, budget)
    n_row_tiles = pl.cdiv(N, tm)

    in_specs = [pl.BlockSpec((tm, in_fw), lambda i: (i, 0))]
    operands = [x]
    for wt, b2, out_pad, conds in plan:
        in_specs.append(pl.BlockSpec(wt.shape, lambda i: (0, 0)))   # resident
        operands.append(wt)
        in_specs.append(pl.BlockSpec((1, out_pad), lambda i: (0, 0)))
        operands.append(b2)
        for c in conds:
            if c is None:
                continue
            arr, rows_streamed, _ = c
            in_specs.append(_cond_block_spec_1d(rows_streamed, tm,
                                                arr.shape[1]))
            operands.append(arr)

    kernel = _make_siren_stack_kernel(tuple(statics))

    out = pl.pallas_call(
        kernel,
        out_shape=jax.ShapeDtypeStruct((N, last_pad), out_dtype),
        grid_spec=pltpu.PrefetchScalarGridSpec(
            num_scalar_prefetch=0,
            grid=(n_row_tiles,),
            in_specs=in_specs,
            out_specs=pl.BlockSpec((tm, last_pad), lambda i: (i, 0)),
        ),
        compiler_params=pltpu.CompilerParams(
            dimension_semantics=("parallel",),
            vmem_limit_bytes=_vmem_limit(resident, 2 * tm * stream_per_row,
                                         phys),
        ),
    )(*operands)

    return out[:, :last_out_f] if slice_output else out


def init_siren_params(key, in_f, out_f, *, w0=30.0, is_first=False):
    """Deterministic init matching SirenLayer.init_weights()."""
    kw, kb = jax.random.split(key)
    b = (1.0 / in_f) if is_first else (float(np.sqrt(6.0 / in_f)) / w0)
    weight = jax.random.uniform(kw, (out_f, in_f), _F32, -b, b)
    bias = jax.random.uniform(kb, (out_f,), _F32, -3.0, 3.0)
    return weight, bias


if __name__ == "__main__":
    key = jax.random.PRNGKey(0)
    k1, k2, kx, kf, kp = jax.random.split(key, 5)

    # Small PINN-like shapes: ragged batch, lane-sparse widths — exercises the
    # cdiv row grid and the end-to-end 128-lane padded layout.
    batch, in_f, hid_f, out_last, w0 = 201, 32, 48, 3, 30.0

    w1, b1 = init_siren_params(k1, in_f, hid_f, w0=w0, is_first=True)
    w2, b2 = init_siren_params(k2, hid_f, out_last, w0=w0)
    x = jax.random.normal(kx, (batch, in_f), _F32)
    cond_freq = jax.random.uniform(kf, (hid_f,), _F32, 0.5, 1.5)      # per-feature
    cond_phase_raw = jax.random.normal(kp, (batch, hid_f), _F32)      # per-row

    # One-time prep (hoisted transpose / lane padding / cond padding).
    wt1, bb1, of1 = prepare_siren_params(w1, b1)
    wt2, bb2, of2 = prepare_siren_params(w2, b2, in_pad_to=wt1.shape[1])
    cond_phase = prepare_siren_cond(cond_phase_raw, batch, hid_f)

    # Pure-JAX reference (matches the PyTorch module).
    ref1 = jnp.sin(w0 * (cond_freq * (x @ w1.T + b1) + cond_phase_raw))
    ref2 = ref1 @ w2.T + b2

    # --- Single hidden layer with conditioning ------------------------------
    out1 = jax.block_until_ready(
        siren_layer_forward(x, wt1, bb1, of1, cond_freq, cond_phase,
                            w0=w0, is_last=False))
    np.testing.assert_allclose(np.asarray(out1), np.asarray(ref1),
                               rtol=1e-5, atol=1e-4)

    # --- Chained layers in the padded layout (slice only after the last) ----
    h_pad = siren_layer_forward(x, wt1, bb1, of1, cond_freq, cond_phase,
                                w0=w0, is_last=False, slice_output=False)
    out2 = jax.block_until_ready(
        siren_layer_forward(h_pad, wt2, bb2, of2, w0=w0, is_last=True))
    np.testing.assert_allclose(np.asarray(out2), np.asarray(ref2),
                               rtol=1e-4, atol=5e-4)

    # --- Fused two-layer stack (one pallas_call, no activation round-trip) --
    out3 = jax.block_until_ready(siren_stack_forward(
        x,
        [dict(wt=wt1, b2=bb1, out_f=of1, w0=w0, is_last=False,
              cond_freq=cond_freq, cond_phase=cond_phase),
         dict(wt=wt2, b2=bb2, out_f=of2, w0=w0, is_last=True)]))
    np.testing.assert_allclose(np.asarray(out3), np.asarray(ref2),
                               rtol=1e-4, atol=5e-4)

    # --- bf16 matmul inputs (W cast hoisted to prep; x cast in-kernel) ------
    wt1_bf, bb1_bf, _ = prepare_siren_params(w1, b1, dtype=jnp.bfloat16)
    out_bf = jax.block_until_ready(
        siren_layer_forward(x, wt1_bf, bb1_bf, of1, cond_freq, cond_phase,
                            w0=w0, is_last=False))
    assert bool(jnp.all(jnp.isfinite(out_bf)))

    print("KERNEL_OK")
</pallas_src>

<mosaic_0001>
module attributes {stable_mosaic.version = 11 : i64} {
  func.func @kernel(%arg0: i32, %arg1: i32, %arg2: memref<104x32xf32, #tpu.memory_space<vmem>>, %arg3: memref<32x128xf32, #tpu.memory_space<vmem>>, %arg4: memref<1x128xf32, #tpu.memory_space<vmem>>, %arg5: memref<1x128xf32, #tpu.memory_space<vmem>>, %arg6: memref<104x128xf32, #tpu.memory_space<vmem>>, %arg7: memref<104x128xf32, #tpu.memory_space<vmem>>) attributes {dimension_semantics = [#tpu.dimension_semantics<parallel>, #tpu.dimension_semantics<parallel>], iteration_bounds = array<i64: 2, 1>, scalar_prefetch = 0 : i64, scratch_operands = 0 : i64, tpu.core_type = #tpu.core_type<tc>, window_params = [{transform_indices = @transform_0, window_bounds = array<i64: 104, 32>}, {transform_indices = @transform_1, window_bounds = array<i64: 32, 128>}, {transform_indices = @transform_2, window_bounds = array<i64: 1, 128>}, {transform_indices = @transform_3, window_bounds = array<i64: 1, 128>}, {transform_indices = @transform_4, window_bounds = array<i64: 104, 128>}, {transform_indices = @transform_5, window_bounds = array<i64: 104, 128>}]} {
    %c0 = arith.constant 0 : index
    %c0_0 = arith.constant 0 : index
    %0 = vector.load %arg2[%c0, %c0_0] : memref<104x32xf32, #tpu.memory_space<vmem>>, vector<104x32xf32>
    %c0_1 = arith.constant 0 : index
    %c0_2 = arith.constant 0 : index
    %1 = vector.load %arg3[%c0_1, %c0_2] : memref<32x128xf32, #tpu.memory_space<vmem>>, vector<32x128xf32>
    %cst = arith.constant dense<0.000000e+00> : vector<104x128xf32>
    %2 = tpu.matmul %0, %1, %cst {dimension_numbers = #tpu.dot_dimension_numbers<[1], [0], [0], [1], [0, 0, 1, 1], [], []>} : vector<104x32xf32>, vector<32x128xf32>, vector<104x128xf32> -> vector<104x128xf32>
    %c0_3 = arith.constant 0 : index
    %c0_4 = arith.constant 0 : index
    %3 = vector.load %arg4[%c0_3, %c0_4] : memref<1x128xf32, #tpu.memory_space<vmem>>, vector<1x128xf32>
    %4 = vector.broadcast %3 : vector<1x128xf32> to vector<104x128xf32>
    %5 = arith.addf %2, %4 : vector<104x128xf32>
    %c0_5 = arith.constant 0 : index
    %c0_6 = arith.constant 0 : index
    %6 = vector.load %arg5[%c0_5, %c0_6] : memref<1x128xf32, #tpu.memory_space<vmem>>, vector<1x128xf32>
    %7 = vector.broadcast %6 : vector<1x128xf32> to vector<104x128xf32>
    %8 = arith.mulf %7, %5 : vector<104x128xf32>
    %c0_7 = arith.constant 0 : index
    %c0_8 = arith.constant 0 : index
    %9 = vector.load %arg6[%c0_7, %c0_8] : memref<104x128xf32, #tpu.memory_space<vmem>>, vector<104x128xf32>
    %10 = arith.addf %8, %9 : vector<104x128xf32>
    %cst_9 = arith.constant 3.000000e+01 : f32
    %11 = vector.broadcast %cst_9 : f32 to vector<104x128xf32>
    %12 = arith.mulf %11, %10 : vector<104x128xf32>
    %13 = math.sin %12 : vector<104x128xf32>
    %c0_10 = arith.constant 0 : index
    %c0_11 = arith.constant 0 : index
    %14 = vector.load %arg7[%c0_10, %c0_11] : memref<104x128xf32, #tpu.memory_space<vmem>>, vector<104x128xf32>
    tpu.vector_store %arg7[%c0_10, %c0_11], %13 {strides = array<i32>} : memref<104x128xf32, #tpu.memory_space<vmem>>, vector<104x128xf32>,
    return
  }
  func.func @transform_0(%arg0: i32, %arg1: i32) -> (i32, i32) {
    %c0_i32 = arith.constant 0 : i32
    %c0_i32_0 = arith.constant 0 : i32
    return %arg0, %c0_i32 : i32, i32
  }
  func.func @transform_1(%arg0: i32, %arg1: i32) -> (i32, i32) {
    %c0_i32 = arith.constant 0 : i32
    %c0_i32_0 = arith.constant 0 : i32
    return %c0_i32, %arg1 : i32, i32
  }
  func.func @transform_2(%arg0: i32, %arg1: i32) -> (i32, i32) {
    %c0_i32 = arith.constant 0 : i32
    %c0_i32_0 = arith.constant 0 : i32
    return %c0_i32, %arg1 : i32, i32
  }
  func.func @transform_3(%arg0: i32, %arg1: i32) -> (i32, i32) {
    %c0_i32 = arith.constant 0 : i32
    %c0_i32_0 = arith.constant 0 : i32
    return %c0_i32, %arg1 : i32, i32
  }
  func.func @transform_4(%arg0: i32, %arg1: i32) -> (i32, i32) {
    %c0_i32 = arith.constant 0 : i32
    return %arg0, %arg1 : i32, i32
  }
  func.func @transform_5(%arg0: i32, %arg1: i32) -> (i32, i32) {
    %c0_i32 = arith.constant 0 : i32
    return %arg0, %arg1 : i32, i32
  }
}

</mosaic_0001>

<bundles_post_ra>
// kernel: tpu_custom_call.1
= control target key start
LH: loop header
LB: loop body
LE: loop exit
PB: predicated region body
PF: predicated region fallthrough
CT: control target
= control target key end

     0   :  { %10 = vsyncpa [#allocation3], 0  ;;  %s3741_s0 = inlined_call_operand.vmem [shape: f32[201,32], index: 0, kind: input, shape index: {}]   ;;  %s3742_s1 = inlined_call_operand.vmem [shape: f32[32,128], index: 1, kind: input, shape index: {}]   ;;  %s3743_s2 = inlined_call_operand.vmem [shape: f32[1,128], index: 2, kind: input, shape index: {}]   ;;  %s3744_s3 = inlined_call_operand.vmem [shape: f32[1,128], index: 3, kind: input, shape index: {}]   ;;  %s3745_s4 = inlined_call_operand.vmem [shape: f32[201,128], index: 4, kind: input, shape index: {}]   ;;  %s3746_s5 = inlined_call_operand.hbm [shape: f32[201,128], index: 5, kind: output, shape index: {}]  }
   0x1   :  { %12 = vsyncpa [#allocation3 + $0x1], 0  ;;  %s2522_s18 = smov 0   ;;  %s2524_s19 = smov 0  }
   0x2   :  { %s2526_s20 = smov 0   ;;  %s2528_s21 = smov 0  }
   0x3   :  { %s2530_s22 = smov 0   ;;  %s2532_s23 = smov 0  }
   0x4 LB: > { %s2077_s24 = sadd.s32 4294967295, %s2479_s23   ;;  %s2078_s25 = sadd.s32 4294967294, %s2479_s23   ;;  %s2479_s23 = sphi %s2532_s23, %s18_s23   ;;  %s2475_s22 = sphi %s2530_s22, %s3775_s22   ;;  %s2471_s21 = sphi %s2528_s21, %s3774_s21   ;;  %s2467_s20 = sphi %s2526_s20, %s3773_s20   ;;  %s2463_s19 = sphi %s2524_s19, %s3772_s19   ;;  %s2459_s18 = sphi %s2522_s18, %s3771_s18  }
   0x5   : > { %s30_s26 = sadd.s32 1, %s2475_s22  ;;  %s171_s27 = sadd.s32 1, %s2467_s20 }
   0x6   : > { %p32_p0 = scmp.ge.s32.totalorder %s30_s26, 2  ;;  %p181_p1 = scmp.ne.s32.totalorder %s2467_s20, %s2463_s19 }
   0x7   : > { %p182_p2 = scmp.eq.s32.totalorder %s2077_s24, 1  ;;  %p187_p3 = scmp.ne.s32.totalorder %s2463_s19, %s2459_s18 }
   0x8   : > { %s3777_s26 = smov (%p32_p0, %s30_s26), 0  ;;  %p188_p5 = scmp.eq.s32.totalorder %s2078_s25, 1 }
   0x9   : > { %p2562_p4 = por %p182_p2, %p181_p1  ;;  %s166_s29 = ssub.s32 %s2475_s22, %s3777_s26 }
   0xa   : > { %p2084_p6 = scmp.ge.s32.totalorder %s2479_s23, 1  ;;  %p169_p7 = scmp.eq.s32.totalorder %s166_s29, 0 }
   0xb   : > { %p2569_p8 = por %p188_p5, %p187_p3  ;;  %p246_p9 = scmp.lt.s32.totalorder %s2479_s23, 3 }
   0xc   : > { %s2575_s6 = scalar_select %p169_p7, %s2467_s20, %s171_s27  }
   0xd   : > { %p247_p10 = pnand %p2084_p6, %p246_p9 }
   0xe   : > { %s292_s9 = smul.u32 (!%p247_p10), 13, %s2471_s21 }
   0xf   : > { %250 = sbr.rel (%p247_p10) target bundleno = 613 (0x265), region = 40 }
  0x10   : > { %p293_p11 = scmp.lt.s32.totalorder (!%p247_p10), %s292_s9, 25  ;;  %s2157_s29 = smul.u32 (!%p247_p10), 1664, %s2471_s21 }
  0x12   : > { %s3691_s21 = scalar_lea.hbm (!%p247_p10), %s3746_s5, %s2157_s29 }
  0x14   : > { %v334_v0 = vld [vmem:[%s3742_s1 + $0x18] sm:$0xff]  ;;  %v2481_v1 = vmov 0.0   ;;  %v333_v2 = vld [vmem:[%s3742_s1 + $0x10] sm:$0xff]  ;;  %v332_v3 = vld [vmem:[%s3742_s1 + $0x8] sm:$0xff]  ;;  %s3779_s9 = smov (!%p293_p11, %s292_s9), 25  ;;  %vm342_vm0 = vcmask 261120  }
  0x15   : > { %2175 = vmatprep.subr.mxu0 %v2481_v1  ;;  %2222 = vmatprep.subr.mxu1 %v2481_v1  ;;  %v331_v4 = vld [vmem:[%s3742_s1] sm:$0xff]  ;;  %s2085_s16 = sshll.u32 %s3779_s9, 3  ;;  %vm2482_vm1 = vmmov 0   ;;  %s289_s9 = sand.u32 1, %s2463_s19  }
  0x16   : > { %2176 = vmatpush3.msra.mxu0 %v334_v0  ;;  %2226 = vmatpush3.msra.mxu1 %v334_v0  ;;  %s2598_s25 = scalar_lea.vmem %s3741_s0, %s2085_s16  ;;  %v2642_v18 = vld [vmem:[%s3743_s2] ss:$0 sm:$0xff]  ;;  %s2649_s10 = scalar_lea.vmem %s3745_s4, %s2085_s16 }
  0x17   : > { %2177 = vmatprep.subr.mxu0 %v2481_v1  ;;  %2223 = vmatprep.subr.mxu1 %v2481_v1  ;;  %v318_v5 = vld [vmem:[%s2598_s25] sm:$0xff]  ;;  %v325_v6 = vld [vmem:[%s2598_s25 + $0x38] sm:$0xff]  ;;  %v319_v7 = vld [vmem:[%s2598_s25 + $0x8] sm:$0xff]  ;;  %s2944_s13 = smul.u32 104, %s289_s9  ;;  %s3696_s11 = scalar_lea.sflag [#allocation3], %s289_s9 }
  0x18   : > { %2178 = vmatpush3.msra.mxu0 %v333_v2  ;;  %2227 = vmatpush3.msra.mxu1 %v333_v2  ;;  %v326_v8 = vld [vmem:[%s2598_s25 + $0x40] sm:$0xff]  ;;  %v320_v9 = vld [vmem:[%s2598_s25 + $0x10] sm:$0xff]  ;;  %v327_v10 = vld [vmem:[%s2598_s25 + $0x48] sm:$0xff] }
  0x19   : > { %2179 = vmatprep.subr.mxu0 %v2481_v1  ;;  %2224 = vmatprep.subr.mxu1 %v2481_v1  ;;  %v321_v11 = vld [vmem:[%s2598_s25 + $0x18] sm:$0xff]  ;;  %v328_v12 = vld [vmem:[%s2598_s25 + $0x50] sm:$0xff]  ;;  %v322_v13 = vld [vmem:[%s2598_s25 + $0x20] sm:$0xff]  ;;  %s2985_s14 = scalar_lea.vmem [#allocation2], %s2944_s13  ;;  %s2489_s13 = smov [#allocation2]  }
  0x1a   : > { %2180 = vmatpush3.msra.mxu0 %v332_v3  ;;  %2228 = vmatpush3.msra.mxu1 %v332_v3  ;;  %v329_v14 = vld [vmem:[%s2598_s25 + $0x58] sm:$0xff]  ;;  %v323_v15 = vld [vmem:[%s2598_s25 + $0x28] sm:$0xff]  ;;  %v330_v16 = vld [vmem:[%s2598_s25 + $0x60] sm:$0xff]  ;;  %s1951_s7 = sshll.u32 %s2985_s14, 4  ;;  %s2407_s15 = sshll.u32 %s2489_s13, 4  ;;  %s3685_s7 = int_to_ptr.vmem [resolvable:$true] %s1951_s7  ;;  %s2408_s15 = int_to_ptr.vmem [resolvable:$false] %s2407_s15 }
  0x1b   : > { %2181 = vmatprep.subr.mxu0 %v2481_v1  ;;  %2225 = vmatprep.subr.mxu1 %v2481_v1  ;;  %v324_v17 = vld [vmem:[%s2598_s25 + $0x30] sm:$0xff]  ;;  %v2654_v20 = vld [vmem:[%s3744_s3] ss:$0 sm:$0xff]  ;;  %v539_v25 = vld [vmem:[%s2649_s10 + $0x38] sm:$0xff]  ;;  %s2403_s12 = scalar_lea.vmem %s3685_s7, 1664  ;;  %s2409_s16 = scalar_lea.vmem %s2408_s15, 3328 }
  0x1c   : > { %2182 = vmatpush3.msra.mxu0 %v331_v4  ;;  %2229 = vmatpush3.msra.mxu1 %v331_v4  ;;  %v532_v24 = vld [vmem:[%s2649_s10] sm:$0xff]  ;;  %v533_v40 = vld [vmem:[%s2649_s10 + $0x8] sm:$0xff]  ;;  %p2404_p12 = scmp.ne.s32.totalorder %s3685_s7, %s2403_s12  ;;  %p2410_p1 = scmp.lt.s32.totalorder %s3685_s7, %s2408_s15 }
  0x1d   : > { %2183 = vmatprep.mubr.msk.f32.mxu0 %vm2482_vm1, %v2481_v1  ;;  %2204 = vmatprep.mubr.msk.f32.mxu1 %vm2482_vm1, %v2481_v1  ;;  %v540_v3 = vld [vmem:[%s2649_s10 + $0x40] sm:$0xff]  ;;  %p2411_p2 = scmp.lt.s32.totalorder %s2409_s16, %s2403_s12 }
  0x1e   : > { %2184 = vmatmul.mubr.msk.f32.vlgmr.msra.gmra.mxu0 %vm342_vm0, %v318_v5  ;;  %2205 = vmatmul.mubr.msk.f32.vlgmr.msra.gmra.mxu1 %vm342_vm0, %v325_v6  ;;  %p2405_p13 = pnand %p2404_p12, %p2562_p4 }
  0x1f   : > { %2186 = vmatprep.mubr.msk.f32.mxu0 %vm2482_vm1, %v2481_v1  ;;  %2207 = vmatprep.mubr.msk.f32.mxu1 %vm2482_vm1, %v2481_v1  ;;  %p2412_p3 = por %p2411_p2, %p2410_p1 }
  0x20   : > { %p2406_p0 = pneg %p2405_p13 }
  0x22   : > { %2187 = vmatmul.mubr.msk.f32.gmra.mxu0 %vm342_vm0, %v319_v7  ;;  %2208 = vmatmul.mubr.msk.f32.gmra.mxu1 %vm342_vm0, %v326_v8  ;;  %p2413_p5 = pnand %p2412_p3, %p2406_p0 }
  0x23   : > { %2189 = vmatprep.mubr.msk.f32.mxu0 %vm2482_vm1, %v2481_v1  ;;  %2210 = vmatprep.mubr.msk.f32.mxu1 %vm2482_vm1, %v2481_v1 }
  0x26   : > { %2190 = vmatmul.mubr.msk.f32.gmra.mxu0 %vm342_vm0, %v320_v9  ;;  %2211 = vmatmul.mubr.msk.f32.gmra.mxu1 %vm342_vm0, %v327_v10 }
  0x27   : > { %2192 = vmatprep.mubr.msk.f32.mxu0 %vm2482_vm1, %v2481_v1  ;;  %2213 = vmatprep.mubr.msk.f32.mxu1 %vm2482_vm1, %v2481_v1 }
  0x2a   : > { %2193 = vmatmul.mubr.msk.f32.gmra.mxu0 %vm342_vm0, %v321_v11  ;;  %2214 = vmatmul.mubr.msk.f32.gmra.mxu1 %vm342_vm0, %v328_v12 }
  0x2b   : > { %2195 = vmatprep.mubr.msk.f32.mxu0 %vm2482_vm1, %v2481_v1  ;;  %2216 = vmatprep.mubr.msk.f32.mxu1 %vm2482_vm1, %v2481_v1 }
  0x2e   : > { %2196 = vmatmul.mubr.msk.f32.gmra.mxu0 %vm342_vm0, %v322_v13  ;;  %2217 = vmatmul.mubr.msk.f32.gmra.mxu1 %vm342_vm0, %v329_v14 }
  0x2f   : > { %2198 = vmatprep.mubr.msk.f32.mxu0 %vm2482_vm1, %v2481_v1  ;;  %2219 = vmatprep.mubr.msk.f32.mxu1 %vm2482_vm1, %v2481_v1 }
  0x32   : > { %2199 = vmatmul.mubr.msk.f32.gmra.mxu0 %vm342_vm0, %v323_v15  ;;  %2220 = vmatmul.mubr.msk.f32.gmra.mxu1 %vm342_vm0, %v330_v16  ;;  %v2483_v16 = vmov 683565275  }
  0x33   : > { %2201 = vmatprep.mubr.msk.f32.mxu0 %vm2482_vm1, %v2481_v1 }
  0x36   : > { %2202 = vmatmul.mubr.msk.f32.gmra.mxu0 %vm342_vm0, %v324_v17 }
  0xde   : > { %v448_v19 = vpop.f32.mrf.mxu0  ;;  %v483_v21 = vpop.f32.mrf.mxu1 }
  0xdf   : > { %v449_v22 = vadd.f32 %v2642_v18, %v448_v19  ;;  %v484_v23 = vadd.f32 %v2642_v18, %v483_v21 }
  0xe0   : > { %v2185_v26 = vpop.f32.mrf.mxu0  ;;  %v2206_v27 = vpop.f32.mrf.mxu1 }
  0xe1   : > { %v519_v28 = vmul.f32 %v2654_v20, %v449_v22  ;;  %v526_v29 = vmul.f32 %v2654_v20, %v484_v23  ;;  %v2484_v22 = vmov 2475754826   ;;  %v2486_v26 = vmov 2102212464  }
  0xe2   : > { %v453_v30 = vpop.f32.mrf.mxu0  ;;  %v488_v31 = vpop.f32.mrf.mxu1 }
  0xe3   : > { %v545_v32 = vadd.f32 %v532_v24, %v519_v28  ;;  %v552_v33 = vadd.f32 %v539_v25, %v526_v29  ;;  %v454_v34 = vadd.f32 %v2642_v18, %v453_v30  ;;  %v489_v51 = vadd.f32 %v2642_v18, %v488_v31 }
  0xe4   : > { %v2188_v35 = vpop.f32.mrf.mxu0  ;;  %v2209_v36 = vpop.f32.mrf.mxu1  ;;  %v2485_v24 = vmov 2131351028   ;;  %v2487_v28 = vmov 920167782  }
  0xe5   : > { %v2663_v37 = vmul.f32 30.0, %v545_v32  ;;  %v2665_v38 = vmul.f32 30.0, %v552_v33  ;;  %v520_v39 = vmul.f32 %v2654_v20, %v454_v34  ;;  %v527_v61 = vmul.f32 %v2654_v20, %v489_v51 }
  0xe6   : > { %v2669_v41 = vpop.f32.mrf.mxu0  ;;  %v2671_v42 = vpop.f32.mrf.mxu1  ;;  %v2488_v35 = vmov 1326507024  }
  0xe7   : > { %v571_v43 = vand.u32 2147483647, %v2663_v37  ;;  %v574_v44 = vand.u32 2139095040, %v2663_v37  ;;  %v1299_v45 = vand.u32 2147483647, %v2665_v38  ;;  %v1302_v46 = vand.u32 2139095040, %v2665_v38 }
  0xe8   : > { %v2191_v47 = vpop.f32.mrf.mxu0  ;;  %v2212_v48 = vpop.f32.mrf.mxu1  ;;  %v546_v50 = vadd.f32 %v533_v40, %v520_v39  ;;  %v2691_v10 = vadd.f32 %v540_v3, %v527_v61  ;;  %vm573_vm15 = vcmp.lt.s32.totalorder %v2663_v37, 0  ;;  %vm1301_vm0 = vcmp.lt.s32.totalorder %v2665_v38, 0 }
  0xe9   : > { %v575_v49 = vshrl.u32 %v574_v44, 23  ;;  %v578_v52 = vand.u32 8388607, %v571_v43  ;;  %v1303_v53 = vshrl.u32 %v1302_v46, 23  ;;  %v1306_v54 = vand.u32 8388607, %v1299_v45 }
  0xea   : > { %v2682_v55 = vpop.f32.mrf.mxu0  ;;  %v2684_v57 = vmul.f32 30.0, %v546_v50  ;;  %v2687_v62 = vpop.f32.mrf.mxu1 }
  0xeb   : > { %v2102_v56 = vadd.s32 4294967169, %v575_v49  ;;  %v2130_v58 = vadd.s32 4294967169, %v1303_v53  ;;  %v579_v63 = vor.u32 8388608, %v578_v52  ;;  %v1307_v0 = vor.u32 8388608, %v1306_v54 }
  0xec   : > { %v2194_v59 = vpop.f32.mrf.mxu0  ;;  %v678_v2 = vand.u32 2139095040, %v2684_v57  ;;  %v2215_v4 = vpop.f32.mrf.mxu1  ;;  %v675_v14 = vand.u32 2147483647, %v2684_v57 }
  0xed   : > { %v581_v60 = vadd.s32 1, %v2102_v56  ;;  %v1309_v1 = vadd.s32 1, %v2130_v58  ;;  %v2693_v11 = vshll.u32 %v579_v63, 8  ;;  %v2697_v13 = vshll.u32 %v1307_v0, 8 }
  0xee   : > { %v679_v6 = vshrl.u32 %v678_v2, 23 }
  0xef   : > { %vm582_vm2 = vcmp.gt.s32.totalorder %v581_v60, 0  ;;  %vm1310_vm3 = vcmp.gt.s32.totalorder %v1309_v1, 0 }
  0xf0   : > { %v583_v5 = vsel %vm582_vm2, %v581_v60, 0  ;;  %v1311_v9 = vsel %vm1310_vm3, %v1309_v1, 0  ;;  %v2701_v21 = vadd.s32 4294967169, %v679_v6  ;;  %vm2815_vm3 = vcmp.le.f32.partialorder %v571_v43, 0.7853982 }
  0xf1   : > { %v584_v7 = vshrl.u32 %v583_v5, 5  ;;  %v585_v8 = vand.u32 31, %v583_v5  ;;  %v2695_v12 = vshrl.u32 %v1311_v9, 5  ;;  %v1313_v19 = vand.u32 31, %v1311_v9 }
  0xf3   : > { %v586_v15 = vsub.s32 32, %v585_v8  ;;  %v588_v17 = vshll.u32 %v2483_v16, %v585_v8  ;;  %v591_v23 = vshll.u32 %v2484_v22, %v585_v8  ;;  %v594_v25 = vshll.u32 %v2485_v24, %v585_v8 }
  0xf4   : > { %v597_v27 = vshll.u32 %v2486_v26, %v585_v8  ;;  %v600_v29 = vshll.u32 %v2487_v28, %v585_v8  ;;  %vm603_vm4 = vcmp.lt.s32.totalorder %v584_v7, 1  ;;  %vm605_vm5 = vcmp.lt.s32.totalorder %v584_v7, 3 }
  0xf5   : > { %v589_v30 = vshrl.u32 %v2484_v22, %v586_v15  ;;  %v592_v31 = vshrl.u32 %v2485_v24, %v586_v15  ;;  %v595_v32 = vshrl.u32 %v2486_v26, %v586_v15  ;;  %v587_v33 = vshrl.u32 %v2483_v16, %v586_v15 }
  0xf6   : > { %v598_v34 = vshrl.u32 %v2487_v28, %v586_v15  ;;  %v601_v36 = vshrl.u32 %v2488_v35, %v586_v15  ;;  %v1314_v46 = vsub.s32 32, %v1313_v19  ;;  %vm606_vm6 = vcmp.lt.s32.totalorder %v584_v7, 4 }
  0xf7   : > { %v590_v39 = vor.u32 %v589_v30, %v588_v17  ;;  %v593_v40 = vor.u32 %v592_v31, %v591_v23  ;;  %v596_v44 = vor.u32 %v595_v32, %v594_v25  ;;  %v1316_v49 = vshll.u32 %v2483_v16, %v1313_v19 }
  0xf8   : > { %v599_v47 = vor.u32 %v598_v34, %v597_v27  ;;  %v602_v48 = vor.u32 %v601_v36, %v600_v29  ;;  %v1319_v59 = vshll.u32 %v2484_v22, %v1313_v19  ;;  %vm604_vm7 = vcmp.lt.s32.totalorder %v584_v7, 2 }
  0xf9   : > { %v607_v50 = vsel %vm603_vm4, %v587_v33, %v590_v39  ;;  %v608_v51 = vsel %vm606_vm6, %v596_v44, 2102212464  ;;  %v611_v52 = vsel %vm603_vm4, %v590_v39, %v593_v40  ;;  %v615_v53 = vsel %vm603_vm4, %v593_v40, %v596_v44 }
  0xfa   : > { %v609_v54 = vsel %vm605_vm5, %v593_v40, %v608_v51  ;;  %v612_v56 = vsel %vm606_vm6, %v599_v47, 920167782  ;;  %v616_v58 = vsel %vm606_vm6, %v602_v48, 1326507024  ;;  %v1317_v63 = vshrl.u32 %v2484_v22, %v1314_v46 }
  0xfb   : > { %v613_v60 = vsel %vm605_vm5, %v596_v44, %v612_v56  ;;  %v617_v61 = vsel %vm605_vm5, %v599_v47, %v616_v58  ;;  %v610_v0 = vsel %vm604_vm7, %v607_v50, %v609_v54  ;;  %v1320_v3 = vshrl.u32 %v2485_v24, %v1314_v46 }
  0xfc   : > { %v614_v1 = vsel %vm604_vm7, %v611_v52, %v613_v60  ;;  %v618_v2 = vsel %vm604_vm7, %v615_v53, %v617_v61  ;;  %v1318_v9 = vor.u32 %v1317_v63, %v1316_v49  ;;  %v1322_v7 = vshll.u32 %v2485_v24, %v1313_v19 }
  0xfd   : > { %v2724_v4 = vmul.u32.u64.low %v2693_v11, %v618_v2  ;;  %v2725_v5 = vmul.u32.u64.high %v2693_v11, %v618_v2, %v2724_v4  ;;  %v2728_v6 = vmul.u32.u64.low %v2693_v11, %v614_v1  ;;  %v2729_v8 = vmul.u32.u64.high %v2693_v11, %v614_v1, %v2728_v6 }
  0xfe   : > { %v1321_v15 = vor.u32 %v1320_v3, %v1319_v59  ;;  %v1323_v17 = vshrl.u32 %v2486_v26, %v1314_v46  ;;  %v1325_v23 = vshll.u32 %v2486_v26, %v1313_v19  ;;  %v1326_v25 = vshrl.u32 %v2487_v28, %v1314_v46  ;;  %v2764_v3 = vpop.f32.mrf.mxu0 }
  0xff   : > { %v1328_v27 = vshll.u32 %v2487_v28, %v1313_v19  ;;  %v1329_v29 = vshrl.u32 %v2488_v35, %v1314_v46  ;;  %v626_v30 = vmul.u32 %v2693_v11, %v610_v0  ;;  %v1315_v31 = vshrl.u32 %v2483_v16, %v1314_v46 }
 0x100   : > { %v1324_v32 = vor.u32 %v1323_v17, %v1322_v7  ;;  %vm1331_vm8 = vcmp.lt.s32.totalorder %v2695_v12, 1  ;;  %vm628_vm9 = vc.u32 %v2725_v5, %v2728_v6  ;;  %v629_v33 = vadd.s32 1, %v2729_v8 }
 0x101   : > { %v1327_v34 = vor.u32 %v1326_v25, %v1325_v23  ;;  %vm1332_vm10 = vcmp.lt.s32.totalorder %v2695_v12, 2  ;;  %v1330_v36 = vor.u32 %v1329_v29, %v1328_v27  ;;  %vm1333_vm11 = vcmp.lt.s32.totalorder %v2695_v12, 3  ;;  %v2197_v23 = vpop.f32.mrf.mxu0 }
 0x102   : > { %vm1334_vm12 = vcmp.lt.s32.totalorder %v2695_v12, 4  ;;  %v1339_v19 = vsel %vm1331_vm8, %v1318_v9, %v1321_v15  ;;  %v630_v11 = vsel %vm628_vm9, %v629_v33, %v2729_v8  ;;  %v1343_v44 = vsel %vm1331_vm8, %v1321_v15, %v1324_v32 }
 0x103   : > { %v1336_v39 = vsel %vm1334_vm12, %v1324_v32, 2102212464  ;;  %v1340_v40 = vsel %vm1334_vm12, %v1327_v34, 920167782  ;;  %v631_v46 = vadd.s32 %v630_v11, %v626_v30  ;;  %v1335_v47 = vsel %vm1331_vm8, %v1315_v31, %v1318_v9 }
 0x104   : > { %v1341_v48 = vsel %vm1333_vm11, %v1324_v32, %v1340_v40  ;;  %v1344_v49 = vsel %vm1334_vm12, %v1330_v36, 1326507024  ;;  %v1337_v50 = vsel %vm1333_vm11, %v1321_v15, %v1336_v39  ;;  %v685_v53 = vadd.s32 1, %v2701_v21 }
 0x105   : > { %v1342_v51 = vsel %vm1332_vm10, %v1339_v19, %v1341_v48  ;;  %v1345_v52 = vsel %vm1333_vm11, %v1327_v34, %v1344_v49  ;;  %v632_v54 = vadd.s32 536870912, %v631_v46  ;;  %v682_v63 = vand.u32 8388607, %v675_v14 }
 0x106   : > { %v1346_v56 = vsel %vm1332_vm10, %v1343_v44, %v1345_v52  ;;  %v2752_v58 = vmul.u32.u64.low %v2697_v13, %v1342_v51  ;;  %v2753_v59 = vmul.u32.u64.high %v2697_v13, %v1342_v51, %v2752_v58  ;;  %vm686_vm13 = vcmp.gt.s32.totalorder %v685_v53, 0 }
 0x107   : > { %v2757_v60 = vmul.u32.u64.low %v2697_v13, %v1346_v56  ;;  %v2758_v61 = vmul.u32.u64.high %v2697_v13, %v1346_v56, %v2757_v60  ;;  %v633_v0 = vshrl.u32 %v632_v54, 30  ;;  %v1338_v21 = vsel %vm1332_vm10, %v1335_v47, %v1337_v50 }
 0x108   : > { %v687_v1 = vsel %vm686_vm13, %v685_v53, 0  ;;  %v1357_v8 = vadd.s32 1, %v2753_v59  ;;  %v2768_v9 = vmul.f32 30.0, %v2691_v10  ;;  %v1354_v15 = vmul.u32 %v2697_v13, %v1338_v21 }
 0x109   : > { %v689_v2 = vand.u32 31, %v687_v1  ;;  %v634_v4 = vshll.u32 %v633_v0, 30  ;;  %vm1356_vm14 = vc.u32 %v2758_v61, %v2752_v58  ;;  %v683_v7 = vor.u32 8388608, %v682_v63 }
 0x10a   : > { %v1358_v25 = vsel %vm1356_vm14, %v1357_v8, %v2753_v59  ;;  %v2779_v29 = vadd.f32 %v2642_v18, %v2669_v41  ;;  %v627_v10 = vadd.s32 %v2728_v6, %v2725_v5  ;;  %v1403_v30 = vand.u32 2147483647, %v2768_v9 }
 0x10b   : > { %v690_v17 = vsub.s32 32, %v689_v2  ;;  %v2773_v12 = vsub.s32 %v631_v46, %v634_v4  ;;  %v1359_v27 = vadd.s32 %v1358_v25, %v1354_v15  ;;  %v2786_v31 = vadd.f32 %v2642_v18, %v2671_v42 }
 0x10c   : > { %v2789_v34 = vshll.u32 %v683_v7, 8  ;;  %v1406_v36 = vand.u32 2139095040, %v2768_v9  ;;  %v2793_v19 = vshrl.u32 %v687_v1, 5  ;;  %v657_v11 = vsub.s32 4, %v633_v0 }
 0x10d   : > { %v637_v13 = vsub.s32 0, %v2773_v12  ;;  %v1360_v32 = vadd.s32 536870912, %v1359_v27  ;;  %v693_v33 = vshrl.u32 %v2484_v22, %v690_v17  ;;  %v696_v5 = vshrl.u32 %v2485_v24, %v690_v17 }
 0x10e   : > { %v699_v6 = vshrl.u32 %v2486_v26, %v690_v17  ;;  %v692_v42 = vshll.u32 %v2483_v16, %v689_v2  ;;  %v702_v40 = vshrl.u32 %v2487_v28, %v690_v17  ;;  %v695_v46 = vshll.u32 %v2484_v22, %v689_v2 }
 0x10f   : > { %v2103_v41 = vmin.u32 %v637_v13, %v2773_v12  ;;  %v1361_v39 = vshrl.u32 %v1360_v32, 30  ;;  %v698_v47 = vshll.u32 %v2485_v24, %v689_v2  ;;  %v705_v48 = vshrl.u32 %v2488_v35, %v690_v17 }
 0x110   : > { %v694_v50 = vor.u32 %v693_v33, %v692_v42  ;;  %v701_v51 = vshll.u32 %v2486_v26, %v689_v2  ;;  %v1407_v52 = vshrl.u32 %v1406_v36, 23  ;;  %v697_v54 = vor.u32 %v696_v5, %v695_v46  ;;  %v2841_v42 = vpop.f32.mrf.mxu1 }
 0x111   : > { %v639_v44 = vclz %v2103_v41  ;;  %v1362_v49 = vshll.u32 %v1361_v39, 30  ;;  %v700_v56 = vor.u32 %v699_v6, %v698_v47  ;;  %v704_v59 = vshll.u32 %v2487_v28, %v689_v2 }
 0x112   : > { %v2806_v60 = vsel %vm573_vm15, %v657_v11, %v633_v0  ;;  %v691_v21 = vshrl.u32 %v2483_v16, %v690_v17  ;;  %v703_v1 = vor.u32 %v702_v40, %v701_v51  ;;  %v1385_v4 = vsub.s32 4, %v1361_v39  ;;  %v2218_v51 = vpop.f32.mrf.mxu1 }
 0x113   : > { %v2104_v53 = vadd.s32 4294967294, %v639_v44  ;;  %v2809_v63 = vsub.s32 %v1359_v27, %v1362_v49  ;;  %v706_v8 = vor.u32 %v705_v48, %v704_v59  ;;  %vm707_vm2 = vcmp.lt.s32.totalorder %v2793_v19, 1 }
 0x114   : > { %vm709_vm4 = vcmp.lt.s32.totalorder %v2793_v19, 3  ;;  %vm710_vm5 = vcmp.lt.s32.totalorder %v2793_v19, 4  ;;  %vm2824_vm6 = vcmp.le.f32.partialorder %v1299_v45, 0.7853982  ;;  %v715_v43 = vsel %vm707_vm2, %v694_v50, %v697_v54 }
 0x115   : > { %vm2105_vm1 = vcmp.lt.s32.totalorder %v2104_v53, 0  ;;  %v1365_v15 = vsub.s32 0, %v2809_v63  ;;  %v712_v25 = vsel %vm710_vm5, %v700_v56, 2102212464  ;;  %v716_v32 = vsel %vm710_vm5, %v703_v1, 920167782 }
 0x116   : > { %v642_v0 = vsel %vm2105_vm1, 0, %v2104_v53  ;;  %v719_v33 = vsel %vm707_vm2, %v697_v54, %v700_v56  ;;  %v717_v45 = vsel %vm709_vm4, %v700_v56, %v716_v32  ;;  %v720_v5 = vsel %vm710_vm5, %v706_v8, 1326507024 }
 0x117   : > { %v643_v7 = vsub.s32 32, %v642_v0  ;;  %v647_v17 = vsub.s32 4294967266, %v642_v0  ;;  %v644_v27 = vshll.u32 %v2773_v12, %v642_v0  ;;  %v2131_v13 = vmin.u32 %v1365_v15, %v2809_v63 }
 0x118   : > { %vm708_vm7 = vcmp.lt.s32.totalorder %v2793_v19, 2  ;;  %v711_v11 = vsel %vm707_vm2, %v691_v21, %v694_v50  ;;  %v713_v12 = vsel %vm709_vm4, %v697_v54, %v712_v25  ;;  %v721_v46 = vsel %vm709_vm4, %v703_v1, %v720_v5 }
 0x119   : > { %v645_v36 = vshrl.u32 %v627_v10, %v643_v7  ;;  %v648_v41 = vadd.s32 127, %v647_v17  ;;  %v1367_v6 = vclz %v2131_v13  ;;  %v718_v10 = vsel %vm708_vm7, %v715_v43, %v717_v45 }
 0x11a   : > { %v722_v48 = vsel %vm708_vm7, %v719_v33, %v721_v46  ;;  %v2850_v49 = vmul.u32.u64.low %v2789_v34, %v718_v10  ;;  %v2851_v50 = vmul.u32.u64.high %v2789_v34, %v718_v10, %v2850_v49  ;;  %v1386_v54 = vsel %vm1301_vm0, %v1385_v4, %v1361_v39 }
 0x11b   : > { %v646_v40 = vor.u32 %v645_v36, %v644_v27  ;;  %v649_v44 = vshll.u32 %v648_v41, 23  ;;  %v2132_v47 = vadd.s32 4294967294, %v1367_v6  ;;  %v1355_v21 = vadd.s32 %v2752_v58, %v2758_v61 }
 0x11c   : > { %v2857_v56 = vmul.u32.u64.low %v2789_v34, %v722_v48  ;;  %v2858_v59 = vmul.u32.u64.high %v2789_v34, %v722_v48, %v2857_v56  ;;  %v714_v1 = vsel %vm708_vm7, %v711_v11, %v713_v12  ;;  %v2134_v8 = vadd.s32 4294967169, %v1407_v52 }
 0x11d   : > { %v650_v53 = vor.u32 4788187, %v649_v44  ;;  %vm2133_vm8 = vcmp.lt.s32.totalorder %v2132_v47, 0  ;;  %v653_v15 = vcvt.s32.f32 %v646_v40  ;;  %v660_v7 = vsel %vm2815_vm3, 0, %v2806_v60 }
 0x11e   : > { %v1370_v17 = vsel %vm2133_vm8, 0, %v2132_v47  ;;  %v1388_v25 = vsel %vm2824_vm6, 0, %v1386_v54  ;;  %v733_v43 = vadd.s32 1, %v2851_v50  ;;  %v730_v61 = vmul.u32 %v2789_v34, %v714_v1 }
 0x11f   : > { %v651_v0 = vand.u32 2147483647, %v650_v53  ;;  %v1371_v39 = vsub.s32 32, %v1370_v17  ;;  %v1375_v4 = vsub.s32 4294967266, %v1370_v17  ;;  %vm732_vm9 = vc.u32 %v2858_v59, %v2850_v49 }
 0x120   : > { %v1413_v19 = vadd.s32 1, %v2134_v8  ;;  %v1372_v52 = vshll.u32 %v2809_v63, %v1370_v17  ;;  %v734_v60 = vsel %vm732_vm9, %v733_v43, %v2851_v50  ;;  %v664_v33 = vadd.s32 3, %v660_v7 }
 0x121   : > { %v654_v58 = vmul.f32 %v653_v15, %v651_v0  ;;  %v1373_v27 = vshrl.u32 %v1355_v21, %v1371_v39  ;;  %v1376_v13 = vadd.s32 127, %v1375_v4  ;;  %v735_v36 = vadd.s32 %v734_v60, %v730_v61  ;;  %v534_v15 = vld [vmem:[%s2649_s10 + $0x10] sm:$0xff] }
 0x122   : > { %vm1414_vm10 = vcmp.gt.s32.totalorder %v1413_v19, 0  ;;  %v1392_v5 = vadd.s32 3, %v1388_v25  ;;  %v1410_v12 = vand.u32 8388607, %v1403_v30  ;;  %v2882_v10 = vand.u32 3, %v664_v33 }
 0x123   : > { %v655_v32 = vxor.u32 2147483648, %v654_v58  ;;  %v1374_v41 = vor.u32 %v1373_v27, %v1372_v52  ;;  %v1377_v45 = vshll.u32 %v1376_v13, 23  ;;  %v1415_v6 = vsel %vm1414_vm10, %v1413_v19, 0 }
 0x124   : > { %v736_v11 = vadd.s32 536870912, %v735_v36  ;;  %v1417_v63 = vand.u32 31, %v1415_v6  ;;  %v2884_v51 = vand.u32 3, %v1392_v5  ;;  %vm677_vm11 = vcmp.lt.s32.totalorder %v2684_v57, 0 }
 0x125   : > { %v656_v34 = vsel %vm573_vm15, %v655_v32, %v654_v58  ;;  %v1378_v44 = vor.u32 4788187, %v1377_v45  ;;  %v1381_v50 = vcvt.s32.f32 %v1374_v41  ;;  %v1411_v54 = vor.u32 8388608, %v1410_v12 }
 0x126   : > { %v659_v40 = vsel %vm2815_vm3, %v2663_v37, %v656_v34  ;;  %v737_v46 = vshrl.u32 %v736_v11, 30  ;;  %v1418_v47 = vsub.s32 32, %v1417_v63  ;;  %v521_v2 = vmul.f32 %v2654_v20, %v2779_v29 }
 0x127   : > { %2348 = vcosq.f32 %v659_v40  ;;  %v1379_v48 = vand.u32 2147483647, %v1378_v44  ;;  %v2891_v56 = vmul.f32 %v2654_v20, %v2786_v31  ;;  %v1423_v1 = vshll.u32 %v2484_v22, %v1417_v63 }
 0x128   : > { %2350 = vsinq.f32 %v659_v40  ;;  %v738_v53 = vshll.u32 %v737_v46, 30  ;;  %v1426_v8 = vshll.u32 %v2485_v24, %v1417_v63  ;;  %v1429_v0 = vshll.u32 %v2486_v26, %v1417_v63 }
 0x129   : > { %v1382_v21 = vmul.f32 %v1381_v50, %v1379_v48  ;;  %v1424_v17 = vshrl.u32 %v2485_v24, %v1418_v47  ;;  %v1427_v39 = vshrl.u32 %v2486_v26, %v1418_v47  ;;  %v1430_v29 = vshrl.u32 %v2487_v28, %v1418_v47 }
 0x12a   : > { %v2897_v7 = vsub.s32 %v735_v36, %v738_v53  ;;  %v731_v20 = vadd.s32 %v2850_v49, %v2858_v59  ;;  %v1420_v31 = vshll.u32 %v2483_v16, %v1417_v63  ;;  %v1421_v25 = vshrl.u32 %v2484_v22, %v1418_v47 }
 0x12b   : > { %v1383_v4 = vxor.u32 2147483648, %v1382_v21  ;;  %v2907_v58 = vshrl.u32 %v1415_v6, 5  ;;  %v1432_v61 = vshll.u32 %v2487_v28, %v1417_v63  ;;  %v547_v19 = vadd.f32 %v534_v15, %v521_v2 }
 0x12c   : > { %v741_v43 = vsub.s32 0, %v2897_v7  ;;  %vm670_vm12 = vcmp.eq.s32.totalorder %v2882_v10, 2  ;;  %v761_v27 = vsub.s32 4, %v737_v46  ;;  %v1431_v13 = vor.u32 %v1430_v29, %v1429_v0 }
 0x12d   : > { %v1384_v52 = vsel %vm1301_vm0, %v1383_v4, %v1382_v21  ;;  %v1433_v49 = vshrl.u32 %v2488_v35, %v1418_v47  ;;  %vm667_vm13 = vcmp.eq.s32.totalorder %v2882_v10, 0  ;;  %v1425_v32 = vor.u32 %v1424_v17, %v1423_v1  ;;  %v541_v4 = vld [vmem:[%s2649_s10 + $0x48] sm:$0xff] }
 0x12e   : > { %v1387_v59 = vsel %vm2824_vm6, %v2665_v38, %v1384_v52  ;;  %v2107_v60 = vmin.u32 %v741_v43, %v2897_v7  ;;  %v1428_v33 = vor.u32 %v1427_v39, %v1426_v8  ;;  %vm666_vm14 = vcmp.lt.s32.totalorder %v2882_v10, 2 }
 0x12f   : > { %2352 = vcosq.f32 %v1387_v59  ;;  %v1422_v36 = vor.u32 %v1421_v25, %v1420_v31  ;;  %v1434_v41 = vor.u32 %v1433_v49, %v1432_v61  ;;  %v2920_v45 = vshll.u32 %v1411_v54, 8  ;;  %v2974_v49 = vpop.f32.mrf.mxu0 }
 0x130   : > { %vm663_vm15 = vweird.f32 %v2663_v37  ;;  %2354 = vsinq.f32 %v1387_v59  ;;  %v743_v5 = vclz %v2107_v60  ;;  %v1419_v23 = vshrl.u32 %v2483_v16, %v1418_v47 }
 0x131   : > { %vm1438_vm0 = vcmp.lt.s32.totalorder %v2907_v58, 4  ;;  %v2928_v6 = vsel %vm677_vm11, %v761_v27, %v737_v46  ;;  %vm1435_vm1 = vcmp.lt.s32.totalorder %v2907_v58, 1  ;;  %v2931_v11 = vmul.f32 30.0, %v547_v19 }
 0x132   : > { %v1444_v34 = vsel %vm1438_vm0, %v1431_v13, 920167782  ;;  %vm2935_vm2 = vcmp.le.f32.partialorder %v675_v14, 0.7853982  ;;  %v2108_v63 = vadd.s32 4294967294, %v743_v5  ;;  %vm1437_vm3 = vcmp.lt.s32.totalorder %v2907_v58, 3 }
 0x133   : > { %v1440_v40 = vsel %vm1438_vm0, %v1428_v33, 2102212464  ;;  %v1447_v44 = vsel %vm1435_vm1, %v1425_v32, %v1428_v33  ;;  %vm1436_vm4 = vcmp.lt.s32.totalorder %v2907_v58, 2  ;;  %v1443_v47 = vsel %vm1435_vm1, %v1422_v36, %v1425_v32 }
 0x134   : > { %v2349_v46 = vpop.eup %2348  ;;  %v1445_v14 = vsel %vm1437_vm3, %v1428_v33, %v1444_v34  ;;  %v1448_v48 = vsel %vm1438_vm0, %v1434_v41, 1326507024  ;;  %vm2109_vm5 = vcmp.lt.s32.totalorder %v2108_v63, 0  ;;  %v1439_v54 = vsel %vm1435_vm1, %v1419_v23, %v1422_v36  ;;  %v2200_v41 = vpop.f32.mrf.mxu0 }
 0x135   : > { %v2351_v50 = vpop.eup %2350  ;;  %v671_v53 = vxor.u32 2147483648, %v2349_v46  ;;  %v1449_v2 = vsel %vm1437_vm3, %v1431_v13, %v1448_v48  ;;  %v746_v1 = vsel %vm2109_vm5, 0, %v2108_v63  ;;  %v1441_v8 = vsel %vm1437_vm3, %v1425_v32, %v1440_v40 }
 0x136   : > { %v668_v21 = vxor.u32 2147483648, %v2351_v50  ;;  %v1450_v0 = vsel %vm1436_vm4, %v1447_v44, %v1449_v2  ;;  %v747_v17 = vsub.s32 32, %v746_v1  ;;  %v751_v39 = vsub.s32 4294967266, %v746_v1 }
 0x137   : > { %v672_v15 = vsel %vm670_vm12, %v671_v53, %v2351_v50  ;;  %v1446_v29 = vsel %vm1436_vm4, %v1443_v47, %v1445_v14  ;;  %v748_v25 = vshll.u32 %v2897_v7, %v746_v1  ;;  %v782_v13 = vand.u32 2139095040, %v2931_v11 }
 0x138   : > { %v669_v31 = vsel %vm667_vm13, %v2349_v46, %v668_v21  ;;  %v2968_v43 = vmul.u32.u64.low %v2920_v45, %v1450_v0  ;;  %v2969_v61 = vmul.u32.u64.high %v2920_v45, %v1450_v0, %v2968_v43  ;;  %v749_v52 = vshrl.u32 %v731_v20, %v747_v17 }
 0x139   : > { %v673_v19 = vsel %vm666_vm14, %v669_v31, %v672_v15  ;;  %v752_v27 = vadd.s32 127, %v751_v39  ;;  %v2979_v60 = vmul.u32.u64.low %v2920_v45, %v1446_v29  ;;  %v2980_v32 = vmul.u32.u64.high %v2920_v45, %v1446_v29, %v2979_v60 }
 0x13a   : > { %v674_v59 = vsel %vm663_vm15, nan, %v673_v19  ;;  %v554_v7 = vadd.f32 %v541_v4, %v2891_v56  ;;  %v750_v10 = vor.u32 %v749_v52, %v748_v25  ;;  %v1442_v33 = vsel %vm1436_vm4, %v1439_v54, %v1441_v8 }
 0x13b   : > { %1923 = vst [vmem:[%s2985_s14] sm:$0xff] %v674_v59  ;;  %v753_v20 = vshll.u32 %v752_v27, 23  ;;  %v783_v36 = vshrl.u32 %v782_v13, 23  ;;  %vm1391_vm6 = vweird.f32 %v2665_v38  ;;  %vm1398_vm7 = vcmp.eq.s32.totalorder %v2884_v51, 2 }
 0x13c   : > { %v764_v37 = vsel %vm2935_vm2, 0, %v2928_v6  ;;  %v2353_v56 = vpop.eup %2352  ;;  %vm1460_vm8 = vc.u32 %v2969_v61, %v2979_v60  ;;  %v779_v23 = vand.u32 2147483647, %v2931_v11  ;;  %v1458_v40 = vmul.u32 %v2920_v45, %v1442_v33 }
 0x13d   : > { %v754_v5 = vor.u32 4788187, %v753_v20  ;;  %v2110_v34 = vadd.s32 4294967169, %v783_v36  ;;  %v2355_v58 = vpop.eup %2354  ;;  %v1399_v63 = vxor.u32 2147483648, %v2353_v56  ;;  %v1461_v44 = vadd.s32 1, %v2980_v32 }
 0x13e   : > { %v3000_v46 = vmul.f32 30.0, %v554_v7  ;;  %v1396_v47 = vxor.u32 2147483648, %v2355_v58  ;;  %v757_v48 = vcvt.s32.f32 %v750_v10  ;;  %vm1394_vm9 = vcmp.lt.s32.totalorder %v2884_v51, 2 }
 0x13f   : > { %v755_v14 = vand.u32 2147483647, %v754_v5  ;;  %v789_v6 = vadd.s32 1, %v2110_v34  ;;  %vm1395_vm10 = vcmp.eq.s32.totalorder %v2884_v51, 0  ;;  %v1400_v50 = vsel %vm1398_vm7, %v1399_v63, %v2355_v58 }
 0x140   : > { %v1462_v53 = vsel %vm1460_vm8, %v1461_v44, %v2980_v32  ;;  %v1397_v54 = vsel %vm1395_vm10, %v2353_v56, %v1396_v47  ;;  %v768_v1 = vadd.s32 3, %v764_v37  ;;  %v786_v8 = vand.u32 8388607, %v779_v23 }
 0x141   : > { %v758_v45 = vmul.f32 %v757_v48, %v755_v14  ;;  %v1463_v2 = vadd.s32 %v1462_v53, %v1458_v40  ;;  %vm790_vm12 = vcmp.gt.s32.totalorder %v789_v6, 0  ;;  %v1401_v21 = vsel %vm1394_vm9, %v1397_v54, %v1400_v50 }
 0x142   : > { %v791_v0 = vsel %vm790_vm12, %v789_v6, 0  ;;  %v1402_v15 = vsel %vm1391_vm6, nan, %v1401_v21  ;;  %v1510_v51 = vand.u32 2139095040, %v3000_v46  ;;  %v3020_v43 = vand.u32 3, %v768_v1 }
 0x143   : > { %v759_v17 = vxor.u32 2147483648, %v758_v45  ;;  %v1464_v39 = vadd.s32 536870912, %v1463_v2  ;;  %1930 = vst [vmem:[%s2985_s14 + $0x38] sm:$0xff] %v1402_v15  ;;  %v793_v29 = vand.u32 31, %v791_v0  ;;  %v787_v19 = vor.u32 8388608, %v786_v8  ;;  %v3044_v15 = vpop.f32.mrf.mxu1 }
 0x144   : > { %v1511_v13 = vshrl.u32 %v1510_v51, 23  ;;  %v792_v12 = vshrl.u32 %v791_v0, 5  ;;  %vm774_vm14 = vcmp.eq.s32.totalorder %v3020_v43, 2  ;;  %vm771_vm15 = vcmp.eq.s32.totalorder %v3020_v43, 0 }
 0x145   : > { %v760_v4 = vsel %vm677_vm11, %v759_v17, %v758_v45  ;;  %v3015_v31 = vshrl.u32 %v1464_v39, 30  ;;  %v794_v38 = vsub.s32 32, %v793_v29  ;;  %v796_v27 = vshll.u32 %v2483_v16, %v793_v29 }
 0x146   : > { %v763_v25 = vsel %vm2935_vm2, %v2684_v57, %v760_v4  ;;  %v799_v32 = vshll.u32 %v2484_v22, %v793_v29  ;;  %v802_v20 = vshll.u32 %v2485_v24, %v793_v29  ;;  %v805_v37 = vshll.u32 %v2486_v26, %v793_v29 }
 0x147   : > { %2356 = vcosq.f32 %v763_v25  ;;  %v1466_v52 = vshll.u32 %v3015_v31, 30  ;;  %v797_v59 = vshrl.u32 %v2484_v22, %v794_v38  ;;  %v800_v7 = vshrl.u32 %v2485_v24, %v794_v38 }
 0x148   : > { %2358 = vsinq.f32 %v763_v25  ;;  %v803_v33 = vshrl.u32 %v2486_v26, %v794_v38  ;;  %v806_v56 = vshrl.u32 %v2487_v28, %v794_v38  ;;  %v3034_v58 = vshll.u32 %v787_v19, 8 }
 0x149   : > { %v3027_v10 = vsub.s32 %v1463_v2, %v1466_v52  ;;  %v798_v36 = vor.u32 %v797_v59, %v796_v27  ;;  %v801_v41 = vor.u32 %v800_v7, %v799_v32  ;;  %v808_v40 = vshll.u32 %v2487_v28, %v793_v29  ;;  %v2221_v52 = vpop.f32.mrf.mxu1 }
 0x14a   : > { %v804_v34 = vor.u32 %v803_v33, %v802_v20  ;;  %v807_v63 = vor.u32 %v806_v56, %v805_v37  ;;  %v809_v44 = vshrl.u32 %v2488_v35, %v794_v38  ;;  %v2138_v47 = vadd.s32 4294967169, %v1511_v13 }
 0x14b   : > { %v1469_v5 = vsub.s32 0, %v3027_v10  ;;  %v795_v48 = vshrl.u32 %v2483_v16, %v794_v38  ;;  %vm811_vm11 = vcmp.lt.s32.totalorder %v792_v12, 1  ;;  %vm814_vm13 = vcmp.lt.s32.totalorder %v792_v12, 4 }
 0x14c   : > { %v810_v6 = vor.u32 %v809_v44, %v808_v40  ;;  %v816_v50 = vsel %vm814_vm13, %v804_v34, 2102212464  ;;  %v819_v53 = vsel %vm811_vm11, %v798_v36, %v801_v41  ;;  %v820_v54 = vsel %vm814_vm13, %v807_v63, 920167782 }
 0x14d   : > { %v2135_v14 = vmin.u32 %v1469_v5, %v3027_v10  ;;  %vm812_vm0 = vcmp.lt.s32.totalorder %v792_v12, 2  ;;  %vm813_vm1 = vcmp.lt.s32.totalorder %v792_v12, 3  ;;  %v1507_v2 = vand.u32 2147483647, %v3000_v46 }
 0x14e   : > { %vm770_vm2 = vcmp.lt.s32.totalorder %v3020_v43, 2  ;;  %v815_v21 = vsel %vm811_vm11, %v795_v48, %v798_v36  ;;  %v821_v1 = vsel %vm813_vm1, %v804_v34, %v820_v54  ;;  %v823_v8 = vsel %vm811_vm11, %v801_v41, %v804_v34 }
 0x14f   : > { %v1471_v45 = vclz %v2135_v14  ;;  %v824_v0 = vsel %vm814_vm13, %v810_v6, 1326507024  ;;  %vm767_vm3 = vweird.f32 %v2684_v57  ;;  %vm1405_vm4 = vcmp.lt.s32.totalorder %v2768_v9, 0 }
 0x150   : > { %v817_v39 = vsel %vm813_vm1, %v801_v41, %v816_v50  ;;  %v822_v51 = vsel %vm812_vm0, %v819_v53, %v821_v1  ;;  %v825_v29 = vsel %vm813_vm1, %v807_v63, %v824_v0  ;;  %v1517_v38 = vadd.s32 1, %v2138_v47 }
 0x151   : > { %v2136_v17 = vadd.s32 4294967294, %v1471_v45  ;;  %v826_v4 = vsel %vm812_vm0, %v823_v8, %v825_v29  ;;  %v3051_v25 = vmul.u32.u64.low %v3034_v58, %v822_v51  ;;  %v3052_v19 = vmul.u32.u64.high %v3034_v58, %v822_v51, %v3051_v25 }
 0x152   : > { %v1459_v27 = vadd.s32 %v2979_v60, %v2969_v61  ;;  %v3058_v13 = vmul.u32.u64.low %v3034_v58, %v826_v4  ;;  %v3059_v59 = vmul.u32.u64.high %v3034_v58, %v826_v4, %v3058_v13  ;;  %v1514_v20 = vand.u32 8388607, %v1507_v2 }
 0x153   : > { %vm2137_vm5 = vcmp.lt.s32.totalorder %v2136_v17, 0  ;;  %vm1518_vm6 = vcmp.gt.s32.totalorder %v1517_v38, 0  ;;  %v464_v33 = vadd.f32 %v2642_v18, %v2682_v55  ;;  %v818_v61 = vsel %vm812_vm0, %v815_v21, %v817_v39 }
 0x154   : > { %v2357_v32 = vpop.eup %2356  ;;  %v1474_v7 = vsel %vm2137_vm5, 0, %v2136_v17  ;;  %v1489_v5 = vsub.s32 4, %v3015_v31  ;;  %v837_v34 = vadd.s32 1, %v3052_v19  ;;  %v1519_v63 = vsel %vm1518_vm6, %v1517_v38, 0 }
 0x155   : > { %v2359_v36 = vpop.eup %2358  ;;  %v775_v41 = vxor.u32 2147483648, %v2357_v32  ;;  %v1475_v37 = vsub.s32 32, %v1474_v7  ;;  %v1479_v56 = vsub.s32 4294967266, %v1474_v7  ;;  %v1476_v44 = vshll.u32 %v3027_v10, %v1474_v7 }
 0x156   : > { %v772_v60 = vxor.u32 2147483648, %v2359_v36  ;;  %v834_v12 = vmul.u32 %v3034_v58, %v818_v61  ;;  %vm836_vm7 = vc.u32 %v3059_v59, %v3051_v25  ;;  %v1521_v14 = vand.u32 31, %v1519_v63 }
 0x157   : > { %v776_v40 = vsel %vm774_vm14, %v775_v41, %v2359_v36  ;;  %v1477_v47 = vshrl.u32 %v1459_v27, %v1475_v37  ;;  %v1480_v18 = vadd.s32 127, %v1479_v56  ;;  %v838_v53 = vsel %vm836_vm7, %v837_v34, %v3052_v19  ;;  %v3097_v27 = vld [vmem:[%s3744_s3] ss:$0 sm:$0xff] }
 0x158   : > { %v773_v55 = vsel %vm771_vm15, %v2357_v32, %v772_v60  ;;  %v1490_v54 = vsel %vm1405_vm4, %v1489_v5, %v3015_v31  ;;  %v839_v45 = vadd.s32 %v838_v53, %v834_v12  ;;  %v1522_v58 = vsub.s32 32, %v1521_v14 }
 0x159   : > { %v777_v48 = vsel %vm770_vm2, %v773_v55, %v776_v40  ;;  %v1478_v6 = vor.u32 %v1477_v47, %v1476_v44  ;;  %v1481_v50 = vshll.u32 %v1480_v18, 23  ;;  %v1524_v8 = vshll.u32 %v2483_v16, %v1521_v14 }
 0x15a   : > { %v778_v10 = vsel %vm767_vm3, nan, %v777_v48  ;;  %v1527_v43 = vshll.u32 %v2484_v22, %v1521_v14  ;;  %v840_v0 = vadd.s32 536870912, %v839_v45  ;;  %v1525_v17 = vshrl.u32 %v2484_v22, %v1522_v58 }
 0x15b   : > { %1924 = vst [vmem:[%s2985_s14 + $0x8] sm:$0xff] %v778_v10  ;;  %v1482_v21 = vor.u32 4788187, %v1481_v50  ;;  %v1485_v1 = vcvt.s32.f32 %v1478_v6  ;;  %v1528_v57 = vshrl.u32 %v2485_v24, %v1522_v58  ;;  %v1530_v39 = vshll.u32 %v2485_v24, %v1521_v14 }
 0x15c   : > { %v1531_v31 = vshrl.u32 %v2486_v26, %v1522_v58  ;;  %v1533_v29 = vshll.u32 %v2486_v26, %v1521_v14  ;;  %v1534_v4 = vshrl.u32 %v2487_v28, %v1522_v58  ;;  %v841_v19 = vshrl.u32 %v840_v0, 30 }
 0x15d   : > { %v1483_v51 = vand.u32 2147483647, %v1482_v21  ;;  %v1515_v38 = vor.u32 8388608, %v1514_v20  ;;  %v1536_v52 = vshll.u32 %v2487_v28, %v1521_v14  ;;  %v522_v13 = vmul.f32 %v3097_v27, %v464_v33  ;;  %v535_v20 = vld [vmem:[%s2649_s10 + $0x18] sm:$0xff] }
 0x15e   : > { %vm3102_vm8 = vcmp.le.f32.partialorder %v1403_v30, 0.7853982  ;;  %v1520_v36 = vshrl.u32 %v1519_v63, 5  ;;  %v1537_v41 = vshrl.u32 %v2488_v35, %v1522_v58  ;;  %v842_v56 = vshll.u32 %v841_v19, 30 }
 0x15f   : > { %v1486_v7 = vmul.f32 %v1485_v1, %v1483_v51  ;;  %v1492_v37 = vsel %vm3102_vm8, 0, %v1490_v54  ;;  %v1526_v61 = vor.u32 %v1525_v17, %v1524_v8  ;;  %v1529_v60 = vor.u32 %v1528_v57, %v1527_v43 }
 0x160   : > { %v1532_v34 = vor.u32 %v1531_v31, %v1530_v39  ;;  %v1535_v33 = vor.u32 %v1534_v4, %v1533_v29  ;;  %v1538_v40 = vor.u32 %v1537_v41, %v1536_v52  ;;  %v3110_v44 = vsub.s32 %v839_v45, %v842_v56  ;;  %v3149_v56 = vpop.f32.mrf.mxu0 }
 0x161   : > { %v1487_v5 = vxor.u32 2147483648, %v1486_v7  ;;  %v1523_v30 = vshrl.u32 %v2483_v16, %v1522_v58  ;;  %v1555_v47 = vshll.u32 %v1515_v38, 8  ;;  %v548_v18 = vadd.f32 %v535_v20, %v522_v13 }
 0x162   : > { %vm1539_vm9 = vcmp.lt.s32.totalorder %v1520_v36, 1  ;;  %vm1540_vm10 = vcmp.lt.s32.totalorder %v1520_v36, 2  ;;  %vm1541_vm12 = vcmp.lt.s32.totalorder %v1520_v36, 3  ;;  %v845_v12 = vsub.s32 0, %v3110_v44 }
 0x163   : > { %v1488_v63 = vsel %vm1405_vm4, %v1487_v5, %v1486_v7  ;;  %vm1542_vm11 = vcmp.lt.s32.totalorder %v1520_v36, 4  ;;  %v1547_v14 = vsel %vm1539_vm9, %v1526_v61, %v1529_v60  ;;  %v1551_v54 = vsel %vm1539_vm9, %v1529_v60, %v1532_v34 }
 0x164   : > { %v1491_v55 = vsel %vm3102_vm8, %v2768_v9, %v1488_v63  ;;  %v1544_v48 = vsel %vm1542_vm11, %v1532_v34, 2102212464  ;;  %v1548_v6 = vsel %vm1542_vm11, %v1535_v33, 920167782  ;;  %v1552_v50 = vsel %vm1542_vm11, %v1538_v40, 1326507024 }
 0x165   : > { %2360 = vcosq.f32 %v1491_v55  ;;  %v2111_v53 = vmin.u32 %v845_v12, %v3110_v44  ;;  %v1549_v10 = vsel %vm1541_vm12, %v1532_v34, %v1548_v6  ;;  %v865_v45 = vsub.s32 4, %v841_v19 }
 0x166   : > { %2362 = vsinq.f32 %v1491_v55  ;;  %v1550_v58 = vsel %vm1540_vm10, %v1547_v14, %v1549_v10  ;;  %v1553_v21 = vsel %vm1541_vm12, %v1535_v33, %v1552_v50  ;;  %v3125_v1 = vmul.f32 30.0, %v548_v18  ;;  %v2203_v33 = vpop.f32.mrf.mxu0 }
 0x167   : > { %v1496_v8 = vadd.s32 3, %v1492_v37  ;;  %v847_v43 = vclz %v2111_v53  ;;  %v1543_v0 = vsel %vm1539_vm9, %v1523_v30, %v1526_v61  ;;  %v1545_v17 = vsel %vm1541_vm12, %v1529_v60, %v1544_v48 }
 0x168   : > { %v1554_v57 = vsel %vm1540_vm10, %v1551_v54, %v1553_v21  ;;  %v3130_v39 = vmul.u32.u64.low %v1555_v47, %v1550_v58  ;;  %v3131_v51 = vmul.u32.u64.high %v1555_v47, %v1550_v58, %v3130_v39  ;;  %vm781_vm13 = vcmp.lt.s32.totalorder %v2931_v11, 0 }
 0x169   : > { %v2112_v31 = vadd.s32 4294967294, %v847_v43  ;;  %v3135_v29 = vmul.u32.u64.low %v1555_v47, %v1554_v57  ;;  %v3136_v4 = vmul.u32.u64.high %v1555_v47, %v1554_v57, %v3135_v29  ;;  %v866_v38 = vsel %vm781_vm13, %v865_v45, %v841_v19 }
 0x16a   : > { %v886_v52 = vand.u32 2139095040, %v3125_v1  ;;  %vm3143_vm14 = vcmp.le.f32.partialorder %v779_v23, 0.7853982  ;;  %v1546_v32 = vsel %vm1540_vm10, %v1543_v0, %v1545_v17  ;;  %v1497_v7 = vand.u32 3, %v1496_v8 }
 0x16b   : > { %vm2113_vm15 = vcmp.lt.s32.totalorder %v2112_v31, 0  ;;  %v1565_v20 = vadd.s32 1, %v3131_v51  ;;  %v835_v19 = vadd.s32 %v3051_v25, %v3059_v59  ;;  %v868_v23 = vsel %vm3143_vm14, 0, %v866_v38 }
 0x16c   : > { %v850_v41 = vsel %vm2113_vm15, 0, %v2112_v31  ;;  %v887_v37 = vshrl.u32 %v886_v52, 23  ;;  %v1562_v5 = vmul.u32 %v1555_v47, %v1546_v32  ;;  %vm1564_vm0 = vc.u32 %v3136_v4, %v3130_v39  ;;  %v3164_v47 = vld [vmem:[%s3743_s2] ss:$0 sm:$0xff] }
 0x16d   : > { %v851_v61 = vsub.s32 32, %v850_v41  ;;  %v855_v60 = vsub.s32 4294967266, %v850_v41  ;;  %v883_v36 = vand.u32 2147483647, %v3125_v1  ;;  %v852_v40 = vshll.u32 %v3110_v44, %v850_v41 }
 0x16e   : > { %v2114_v34 = vadd.s32 4294967169, %v887_v37  ;;  %v1566_v63 = vsel %vm1564_vm0, %v1565_v20, %v3131_v51  ;;  %vm1495_vm1 = vweird.f32 %v2768_v9  ;;  %v499_v55 = vadd.f32 %v3164_v47, %v2687_v62  ;;  %v542_v51 = vld [vmem:[%s2649_s10 + $0x50] sm:$0xff] }
 0x16f   : > { %v853_v30 = vshrl.u32 %v835_v19, %v851_v61  ;;  %v856_v18 = vadd.s32 127, %v855_v60  ;;  %v1567_v25 = vadd.s32 %v1566_v63, %v1562_v5  ;;  %vm1499_vm2 = vcmp.eq.s32.totalorder %v1497_v7, 0 }
 0x170   : > { %v893_v59 = vadd.s32 1, %v2114_v34  ;;  %vm1502_vm3 = vcmp.eq.s32.totalorder %v1497_v7, 2  ;;  %v872_v50 = vadd.s32 3, %v868_v23  ;;  %v890_v45 = vand.u32 8388607, %v883_v36 }
 0x171   : > { %v854_v44 = vor.u32 %v853_v30, %v852_v40  ;;  %v857_v14 = vshll.u32 %v856_v18, 23  ;;  %v1568_v53 = vadd.s32 536870912, %v1567_v25  ;;  %v529_v43 = vmul.f32 %v3097_v27, %v499_v55 }
 0x172   : > { %v2361_v12 = vpop.eup %2360  ;;  %vm894_vm4 = vcmp.gt.s32.totalorder %v893_v59, 0  ;;  %vm1498_vm5 = vcmp.lt.s32.totalorder %v1497_v7, 2  ;;  %v3175_v29 = vand.u32 3, %v872_v50  ;;  %v891_v20 = vor.u32 8388608, %v890_v45 }
 0x173   : > { %v2363_v48 = vpop.eup %2362  ;;  %v1503_v6 = vxor.u32 2147483648, %v2361_v12  ;;  %v858_v54 = vor.u32 4788187, %v857_v14  ;;  %v895_v58 = vsel %vm894_vm4, %v893_v59, 0  ;;  %v3170_v8 = vshrl.u32 %v1568_v53, 30 }
 0x174   : > { %v1500_v10 = vxor.u32 2147483648, %v2363_v48  ;;  %v897_v62 = vand.u32 31, %v895_v58  ;;  %v861_v57 = vcvt.s32.f32 %v854_v44  ;;  %v469_v37 = vadd.f32 %v3164_v47, %v2764_v3 }
 0x175   : > { %v1504_v21 = vsel %vm1502_vm3, %v1503_v6, %v2363_v48  ;;  %v859_v17 = vand.u32 2147483647, %v858_v54  ;;  %v1570_v38 = vshll.u32 %v3170_v8, 30  ;;  %v1563_v7 = vadd.s32 %v3130_v39, %v3136_v4 }
 0x176   : > { %v1501_v0 = vsel %vm1499_vm2, %v2361_v12, %v1500_v10  ;;  %v898_v52 = vsub.s32 32, %v897_v62  ;;  %v555_v60 = vadd.f32 %v542_v51, %v529_v43  ;;  %v896_v5 = vshrl.u32 %v895_v58, 5 }
 0x177   : > { %v1505_v31 = vsel %vm1498_vm5, %v1501_v0, %v1504_v21  ;;  %v862_v41 = vmul.f32 %v861_v57, %v859_v17  ;;  %v3185_v19 = vsub.s32 %v1567_v25, %v1570_v38  ;;  %v900_v34 = vshll.u32 %v2483_v16, %v897_v62 }
 0x178   : > { %v1506_v32 = vsel %vm1495_vm1, nan, %v1505_v31  ;;  %v901_v61 = vshrl.u32 %v2484_v22, %v898_v52  ;;  %v904_v9 = vshrl.u32 %v2485_v24, %v898_v52  ;;  %v903_v40 = vshll.u32 %v2484_v22, %v897_v62 }
 0x179   : > { %1931 = vst [vmem:[%s2985_s14 + $0x40] sm:$0xff] %v1506_v32  ;;  %v863_v23 = vxor.u32 2147483648, %v862_v41  ;;  %v1573_v33 = vsub.s32 0, %v3185_v19  ;;  %v906_v3 = vshll.u32 %v2485_v24, %v897_v62  ;;  %v907_v30 = vshrl.u32 %v2486_v26, %v898_v52 }
 0x17a   : > { %v902_v4 = vor.u32 %v901_v61, %v900_v34  ;;  %v909_v18 = vshll.u32 %v2486_v26, %v897_v62  ;;  %v910_v63 = vshrl.u32 %v2487_v28, %v898_v52  ;;  %v905_v55 = vor.u32 %v904_v9, %v903_v40 }
 0x17b   : > { %v864_v39 = vsel %vm781_vm13, %v863_v23, %v862_v41  ;;  %v2139_v59 = vmin.u32 %v1573_v33, %v3185_v19  ;;  %v908_v12 = vor.u32 %v907_v30, %v906_v3  ;;  %v912_v14 = vshll.u32 %v2487_v28, %v897_v62  ;;  %v536_v30 = vld [vmem:[%s2649_s10 + $0x20] sm:$0xff] }
 0x17c   : > { %v867_v25 = vsel %vm3143_vm14, %v2931_v11, %v864_v39  ;;  %v911_v44 = vor.u32 %v910_v63, %v909_v18  ;;  %v913_v48 = vshrl.u32 %v2488_v35, %v898_v52  ;;  %vm1509_vm6 = vcmp.lt.s32.totalorder %v3000_v46, 0 }
 0x17d   : > { %2364 = vcosq.f32 %v867_v25  ;;  %v1575_v6 = vclz %v2139_v59  ;;  %v931_v50 = vshll.u32 %v891_v20, 8  ;;  %v523_v53 = vmul.f32 %v3097_v27, %v469_v37 }
 0x17e   : > { %2366 = vsinq.f32 %v867_v25  ;;  %v1593_v13 = vsub.s32 4, %v3170_v8  ;;  %v899_v10 = vshrl.u32 %v2483_v16, %v898_v52  ;;  %v914_v54 = vor.u32 %v913_v48, %v912_v14 }
 0x17f   : > { %v3208_v45 = vmul.f32 30.0, %v555_v60  ;;  %v2140_v58 = vadd.s32 4294967294, %v1575_v6  ;;  %vm915_vm7 = vcmp.lt.s32.totalorder %v896_v5, 1  ;;  %vm917_vm8 = vcmp.lt.s32.totalorder %v896_v5, 3 }
 0x180   : > { %vm918_vm9 = vcmp.lt.s32.totalorder %v896_v5, 4  ;;  %v923_v62 = vsel %vm915_vm7, %v902_v4, %v905_v55  ;;  %v927_v0 = vsel %vm915_vm7, %v905_v55, %v908_v12  ;;  %vm916_vm12 = vcmp.lt.s32.totalorder %v896_v5, 2 }
 0x181   : > { %v920_v21 = vsel %vm918_vm9, %v908_v12, 2102212464  ;;  %v924_v43 = vsel %vm918_vm9, %v911_v44, 920167782  ;;  %vm2141_vm10 = vcmp.lt.s32.totalorder %v2140_v58, 0  ;;  %v919_v31 = vsel %vm915_vm7, %v899_v10, %v902_v4 }
 0x182   : > { %v925_v17 = vsel %vm917_vm8, %v908_v12, %v924_v43  ;;  %v928_v57 = vsel %vm918_vm9, %v914_v54, 1326507024  ;;  %v1578_v51 = vsel %vm2141_vm10, 0, %v2140_v58  ;;  %v921_v20 = vsel %vm917_vm8, %v905_v55, %v920_v21 }
 0x183   : > { %v926_v38 = vsel %vm916_vm12, %v923_v62, %v925_v17  ;;  %v929_v52 = vsel %vm917_vm8, %v911_v44, %v928_v57  ;;  %v1579_v32 = vsub.s32 32, %v1578_v51  ;;  %v1583_v41 = vsub.s32 4294967266, %v1578_v51 }
 0x184   : > { %v930_v37 = vsel %vm916_vm12, %v927_v0, %v929_v52  ;;  %v3218_v23 = vmul.u32.u64.low %v931_v50, %v926_v38  ;;  %v3219_v34 = vmul.u32.u64.high %v931_v50, %v926_v38, %v3218_v23  ;;  %v1580_v9 = vshll.u32 %v3185_v19, %v1578_v51 }
 0x185   : > { %v3215_v61 = vmul.u32.u64.low %v931_v50, %v930_v37  ;;  %v3216_v60 = vmul.u32.u64.high %v931_v50, %v930_v37, %v3215_v61  ;;  %v1581_v33 = vshrl.u32 %v1563_v7, %v1579_v32  ;;  %v1584_v40 = vadd.s32 127, %v1583_v41 }
 0x186   : > { %v1614_v3 = vand.u32 2139095040, %v3208_v45  ;;  %vm874_vm11 = vcmp.lt.s32.totalorder %v3175_v29, 2  ;;  %vm3228_vm13 = vcmp.le.f32.partialorder %v1507_v2, 0.7853982  ;;  %v1594_v4 = vsel %vm1509_vm6, %v1593_v13, %v3170_v8 }
 0x187   : > { %v922_v18 = vsel %vm916_vm12, %v919_v31, %v921_v20  ;;  %vm875_vm14 = vcmp.eq.s32.totalorder %v3175_v29, 0  ;;  %v1582_v7 = vor.u32 %v1581_v33, %v1580_v9  ;;  %v1585_v19 = vshll.u32 %v1584_v40, 23 }
 0x188   : > { %v1615_v63 = vshrl.u32 %v1614_v3, 23  ;;  %vm878_vm15 = vcmp.eq.s32.totalorder %v3175_v29, 2  ;;  %vm940_vm0 = vc.u32 %v3216_v60, %v3218_v23  ;;  %v941_v2 = vadd.s32 1, %v3219_v34 }
 0x189   : > { %v549_v25 = vadd.f32 %v536_v30, %v523_v53  ;;  %v1586_v55 = vor.u32 4788187, %v1585_v19  ;;  %v1596_v8 = vsel %vm3228_vm13, 0, %v1594_v4  ;;  %v938_v5 = vmul.u32 %v931_v50, %v922_v18 }
 0x18a   : > { %v2365_v59 = vpop.eup %2364  ;;  %v2142_v12 = vadd.s32 4294967169, %v1615_v63  ;;  %v1589_v48 = vcvt.s32.f32 %v1582_v7  ;;  %v942_v6 = vsel %vm940_vm0, %v941_v2, %v3219_v34  ;;  %v1611_v13 = vand.u32 2147483647, %v3208_v45 }
 0x18b   : > { %v2367_v44 = vpop.eup %2366  ;;  %v879_v14 = vxor.u32 2147483648, %v2365_v59  ;;  %v1587_v54 = vand.u32 2147483647, %v1586_v55  ;;  %v943_v58 = vadd.s32 %v942_v6, %v938_v5  ;;  %v1600_v62 = vadd.s32 3, %v1596_v8 }
 0x18c   : > { %v876_v10 = vxor.u32 2147483648, %v2367_v44  ;;  %v1621_v21 = vadd.s32 1, %v2142_v12  ;;  %v3247_v43 = vmul.f32 30.0, %v549_v25  ;;  %v504_v50 = vadd.f32 %v3164_v47, %v2841_v42 }
 0x18d   : > { %v880_v53 = vsel %vm878_vm15, %v879_v14, %v2367_v44  ;;  %v1590_v17 = vmul.f32 %v1589_v48, %v1587_v54  ;;  %v944_v57 = vadd.s32 536870912, %v943_v58  ;;  %vm871_vm2 = vweird.f32 %v2931_v11 }
 0x18e   : > { %v877_v0 = vsel %vm875_vm14, %v2365_v59, %v876_v10  ;;  %vm1622_vm1 = vcmp.gt.s32.totalorder %v1621_v21, 0  ;;  %v1618_v31 = vand.u32 8388607, %v1611_v13  ;;  %v990_v20 = vand.u32 2139095040, %v3247_v43 }
 0x18f   : > { %v881_v51 = vsel %vm874_vm11, %v877_v0, %v880_v53  ;;  %v1623_v38 = vsel %vm1622_vm1, %v1621_v21, 0  ;;  %v1591_v32 = vxor.u32 2147483648, %v1590_v17  ;;  %v3258_v41 = vshrl.u32 %v944_v57, 30 }
 0x190   : > { %v882_v52 = vsel %vm871_vm2, nan, %v881_v51  ;;  %v1625_v42 = vand.u32 31, %v1623_v38  ;;  %v3264_v61 = vand.u32 3, %v1600_v62  ;;  %v3268_v29 = vmul.f32 %v3097_v27, %v504_v50 }
 0x191   : > { %1925 = vst [vmem:[%s2985_s14 + $0x10] sm:$0xff] %v882_v52  ;;  %v1592_v37 = vsel %vm1509_vm6, %v1591_v32, %v1590_v17  ;;  %v946_v11 = vshll.u32 %v3258_v41, 30  ;;  %v1619_v9 = vor.u32 8388608, %v1618_v31  ;;  %v1624_v18 = vshrl.u32 %v1623_v38, 5 }
 0x192   : > { %v1595_v34 = vsel %vm3228_vm13, %v3000_v46, %v1592_v37  ;;  %v1626_v33 = vsub.s32 32, %v1625_v42  ;;  %v1628_v40 = vshll.u32 %v2483_v16, %v1625_v42  ;;  %v1631_v30 = vshll.u32 %v2484_v22, %v1625_v42 }
 0x193   : > { %2368 = vcosq.f32 %v1595_v34  ;;  %v3274_v3 = vsub.s32 %v943_v58, %v946_v11  ;;  %v1634_v4 = vshll.u32 %v2485_v24, %v1625_v42  ;;  %v991_v19 = vshrl.u32 %v990_v20, 23 }
 0x194   : > { %2370 = vsinq.f32 %v1595_v34  ;;  %v1629_v7 = vshrl.u32 %v2484_v22, %v1626_v33  ;;  %v1627_v39 = vshrl.u32 %v2483_v16, %v1626_v33  ;;  %v1632_v2 = vshrl.u32 %v2485_v24, %v1626_v33 }
 0x195   : > { %v949_v63 = vsub.s32 0, %v3274_v3  ;;  %v1635_v25 = vshrl.u32 %v2486_v26, %v1626_v33  ;;  %v1637_v55 = vshll.u32 %v2486_v26, %v1625_v42  ;;  %v1638_v8 = vshrl.u32 %v2487_v28, %v1626_v33 }
 0x196   : > { %v1630_v59 = vor.u32 %v1629_v7, %v1628_v40  ;;  %v1640_v5 = vshll.u32 %v2487_v28, %v1625_v42  ;;  %v939_v12 = vadd.s32 %v3218_v23, %v3216_v60  ;;  %v1633_v14 = vor.u32 %v1632_v2, %v1631_v30 }
 0x197   : > { %v2115_v44 = vmin.u32 %v949_v63, %v3274_v3  ;;  %v1636_v48 = vor.u32 %v1635_v25, %v1634_v4  ;;  %v1639_v6 = vor.u32 %v1638_v8, %v1637_v55  ;;  %v1641_v10 = vshrl.u32 %v2488_v35, %v1626_v33 }
 0x198   : > { %v3290_v54 = vshll.u32 %v1619_v9, 8  ;;  %v2118_v58 = vadd.s32 4294967169, %v991_v19  ;;  %vm1643_vm3 = vcmp.lt.s32.totalorder %v1624_v18, 1  ;;  %vm1644_vm4 = vcmp.lt.s32.totalorder %v1624_v18, 2 }
 0x199   : > { %v951_v21 = vclz %v2115_v44  ;;  %vm1645_vm5 = vcmp.lt.s32.totalorder %v1624_v18, 3  ;;  %vm1606_vm6 = vcmp.eq.s32.totalorder %v3264_v61, 2  ;;  %vm885_vm7 = vcmp.lt.s32.totalorder %v3125_v1, 0 }
 0x19a   : > { %v1642_v53 = vor.u32 %v1641_v10, %v1640_v5  ;;  %vm1646_vm8 = vcmp.lt.s32.totalorder %v1624_v18, 4  ;;  %v1647_v60 = vsel %vm1643_vm3, %v1627_v39, %v1630_v59  ;;  %v1651_v23 = vsel %vm1643_vm3, %v1630_v59, %v1633_v14 }
 0x19b   : > { %vm1603_vm9 = vcmp.eq.s32.totalorder %v3264_v61, 0  ;;  %v2116_v62 = vadd.s32 4294967294, %v951_v21  ;;  %v1648_v50 = vsel %vm1646_vm8, %v1636_v48, 2102212464  ;;  %v1652_v0 = vsel %vm1646_vm8, %v1639_v6, 920167782 }
 0x19c   : > { %v1655_v17 = vsel %vm1643_vm3, %v1633_v14, %v1636_v48  ;;  %vm1602_vm10 = vcmp.lt.s32.totalorder %v3264_v61, 2  ;;  %v1649_v57 = vsel %vm1645_vm5, %v1633_v14, %v1648_v50  ;;  %v1653_v51 = vsel %vm1645_vm5, %v1636_v48, %v1652_v0  ;;  %v543_v14 = vld [vmem:[%s2649_s10 + $0x58] sm:$0xff] }
 0x19d   : > { %v1656_v31 = vsel %vm1646_vm8, %v1642_v53, 1326507024  ;;  %v997_v38 = vadd.s32 1, %v2118_v58  ;;  %vm1599_vm12 = vweird.f32 %v3000_v46  ;;  %vm3301_vm11 = vcmp.le.f32.partialorder %v883_v36, 0.7853982 }
 0x19e   : > { %vm2117_vm13 = vcmp.lt.s32.totalorder %v2116_v62, 0  ;;  %v1654_v32 = vsel %vm1644_vm4, %v1651_v23, %v1653_v51  ;;  %v1657_v42 = vsel %vm1645_vm5, %v1639_v6, %v1656_v31  ;;  %v987_v20 = vand.u32 2147483647, %v3247_v43 }
 0x19f   : > { %v954_v37 = vsel %vm2117_vm13, 0, %v2116_v62  ;;  %v1658_v11 = vsel %vm1644_vm4, %v1655_v17, %v1657_v42  ;;  %v3310_v34 = vmul.u32.u64.low %v3290_v54, %v1654_v32  ;;  %v3311_v9 = vmul.u32.u64.high %v3290_v54, %v1654_v32, %v3310_v34 }
 0x1a0   : > { %v955_v33 = vsub.s32 32, %v954_v37  ;;  %v959_v36 = vsub.s32 4294967266, %v954_v37  ;;  %v969_v40 = vsub.s32 4, %v3258_v41  ;;  %v1650_v30 = vsel %vm1644_vm4, %v1647_v60, %v1649_v57  ;;  %v2369_v4 = vpop.eup %2368 }
 0x1a1   : > { %v956_v7 = vshll.u32 %v3274_v3, %v954_v37  ;;  %v3318_v19 = vmul.u32.u64.low %v3290_v54, %v1658_v11  ;;  %v3319_v63 = vmul.u32.u64.high %v3290_v54, %v1658_v11, %v3318_v19  ;;  %vm998_vm14 = vcmp.gt.s32.totalorder %v997_v38, 0  ;;  %v2371_v39 = vpop.eup %2370 }
 0x1a2   : > { %v1607_v2 = vxor.u32 2147483648, %v2369_v4  ;;  %v957_v25 = vshrl.u32 %v939_v12, %v955_v33  ;;  %v960_v59 = vadd.s32 127, %v959_v36  ;;  %v999_v55 = vsel %vm998_vm14, %v997_v38, 0 }
 0x1a3   : > { %v1604_v8 = vxor.u32 2147483648, %v2371_v39  ;;  %v1669_v5 = vadd.s32 1, %v3311_v9  ;;  %v994_v18 = vand.u32 8388607, %v987_v20  ;;  %v1001_v44 = vand.u32 31, %v999_v55 }
 0x1a4   : > { %v1608_v3 = vsel %vm1606_vm6, %v1607_v2, %v2371_v39  ;;  %v958_v48 = vor.u32 %v957_v25, %v956_v7  ;;  %v961_v6 = vshll.u32 %v960_v59, 23  ;;  %v970_v12 = vsel %vm885_vm7, %v969_v40, %v3258_v41 }
 0x1a5   : > { %v1605_v10 = vsel %vm1603_vm9, %v2369_v4, %v1604_v8  ;;  %v1666_v58 = vmul.u32 %v3290_v54, %v1650_v30  ;;  %vm1668_vm15 = vc.u32 %v3319_v63, %v3310_v34  ;;  %v1002_v21 = vsub.s32 32, %v1001_v44 }
 0x1a6   : > { %v1609_v53 = vsel %vm1602_vm10, %v1605_v10, %v1608_v3  ;;  %v962_v60 = vor.u32 4788187, %v961_v6  ;;  %v1670_v23 = vsel %vm1668_vm15, %v1669_v5, %v3311_v9  ;;  %v556_v62 = vadd.f32 %v543_v14, %v3268_v29 }
 0x1a7   : > { %v1610_v41 = vsel %vm1599_vm12, nan, %v1609_v53  ;;  %v972_v50 = vsel %vm3301_vm11, 0, %v970_v12  ;;  %v1671_v0 = vadd.s32 %v1670_v23, %v1666_v58  ;;  %v995_v54 = vor.u32 8388608, %v994_v18 }
 0x1a8   : > { %1932 = vst [vmem:[%s2985_s14 + $0x48] sm:$0xff] %v1610_v41  ;;  %v963_v17 = vand.u32 2147483647, %v962_v60  ;;  %v965_v57 = vcvt.s32.f32 %v958_v48  ;;  %v1005_v51 = vshrl.u32 %v2484_v22, %v1002_v21  ;;  %v1008_v61 = vshrl.u32 %v2485_v24, %v1002_v21 }
 0x1a9   : > { %v1672_v31 = vadd.s32 536870912, %v1671_v0  ;;  %v1000_v38 = vshrl.u32 %v999_v55, 5  ;;  %v1004_v32 = vshll.u32 %v2483_v16, %v1001_v44  ;;  %v1011_v29 = vshrl.u32 %v2486_v26, %v1002_v21 }
 0x1aa   : > { %v966_v46 = vmul.f32 %v965_v57, %v963_v17  ;;  %v1007_v42 = vshll.u32 %v2484_v22, %v1001_v44  ;;  %v1013_v37 = vshll.u32 %v2486_v26, %v1001_v44  ;;  %v1014_v11 = vshrl.u32 %v2487_v28, %v1002_v21 }
 0x1ab   : > { %v3351_v9 = vshrl.u32 %v1672_v31, 30  ;;  %v1006_v33 = vor.u32 %v1005_v51, %v1004_v32  ;;  %v1010_v36 = vshll.u32 %v2485_v24, %v1001_v44  ;;  %v1017_v40 = vshrl.u32 %v2488_v35, %v1002_v21 }
 0x1ac   : > { %v967_v30 = vxor.u32 2147483648, %v966_v46  ;;  %v1009_v4 = vor.u32 %v1008_v61, %v1007_v42  ;;  %v1015_v7 = vor.u32 %v1014_v11, %v1013_v37  ;;  %v1016_v19 = vshll.u32 %v2487_v28, %v1001_v44 }
 0x1ad   : > { %v1674_v39 = vshll.u32 %v3351_v9, 30  ;;  %v1012_v2 = vor.u32 %v1011_v29, %v1010_v36  ;;  %v1035_v25 = vshll.u32 %v995_v54, 8  ;;  %v976_v55 = vadd.s32 3, %v972_v50 }
 0x1ae   : > { %v968_v59 = vsel %vm885_vm7, %v967_v30, %v966_v46  ;;  %v1018_v8 = vor.u32 %v1017_v40, %v1016_v19  ;;  %v3359_v5 = vmul.f32 30.0, %v556_v62  ;;  %vm1019_vm0 = vcmp.lt.s32.totalorder %v1000_v38, 1 }
 0x1af   : > { %v971_v18 = vsel %vm3301_vm11, %v3125_v1, %v968_v59  ;;  %v3364_v14 = vsub.s32 %v1671_v0, %v1674_v39  ;;  %vm1022_vm1 = vcmp.lt.s32.totalorder %v1000_v38, 4  ;;  %v1003_v44 = vshrl.u32 %v2483_v16, %v1002_v21 }
 0x1b0   : > { %2372 = vcosq.f32 %v971_v18  ;;  %v1027_v3 = vsel %vm1019_vm0, %v1006_v33, %v1009_v4  ;;  %v1028_v48 = vsel %vm1022_vm1, %v1015_v7, 920167782  ;;  %vm1021_vm2 = vcmp.lt.s32.totalorder %v1000_v38, 3 }
 0x1b1   : > { %2374 = vsinq.f32 %v971_v18  ;;  %v1677_v6 = vsub.s32 0, %v3364_v14  ;;  %v1024_v12 = vsel %vm1022_vm1, %v1012_v2, 2102212464  ;;  %vm1020_vm3 = vcmp.lt.s32.totalorder %v1000_v38, 2 }
 0x1b2   : > { %v1029_v10 = vsel %vm1021_vm2, %v1012_v2, %v1028_v48  ;;  %v1031_v58 = vsel %vm1019_vm0, %v1009_v4, %v1012_v2  ;;  %v1032_v53 = vsel %vm1022_vm1, %v1018_v8, 1326507024  ;;  %v1023_v60 = vsel %vm1019_vm0, %v1003_v44, %v1006_v33 }
 0x1b3   : > { %v2143_v52 = vmin.u32 %v1677_v6, %v3364_v14  ;;  %v1030_v23 = vsel %vm1020_vm3, %v1027_v3, %v1029_v10  ;;  %v1033_v62 = vsel %vm1021_vm2, %v1015_v7, %v1032_v53  ;;  %v1025_v41 = vsel %vm1021_vm2, %v1009_v4, %v1024_v12  ;;  %v537_v7 = vld [vmem:[%s2649_s10 + $0x28] sm:$0xff] }
 0x1b4   : > { %v1034_v21 = vsel %vm1020_vm3, %v1031_v58, %v1033_v62  ;;  %v3371_v50 = vmul.u32.u64.low %v1035_v25, %v1030_v23  ;;  %v3372_v0 = vmul.u32.u64.high %v1035_v25, %v1030_v23, %v3371_v50  ;;  %v977_v54 = vand.u32 3, %v976_v55 }
 0x1b5   : > { %v1679_v17 = vclz %v2143_v52  ;;  %v474_v57 = vadd.f32 %v3164_v47, %v2974_v49  ;;  %v3377_v51 = vmul.u32.u64.low %v1035_v25, %v1034_v21  ;;  %v3378_v61 = vmul.u32.u64.high %v1035_v25, %v1034_v21, %v3377_v51 }
 0x1b6   : > { %v1718_v31 = vand.u32 2139095040, %v3359_v5  ;;  %v1026_v29 = vsel %vm1020_vm3, %v1023_v60, %v1025_v41  ;;  %vm3384_vm4 = vcmp.le.f32.partialorder %v1611_v13, 0.7853982  ;;  %vm1613_vm5 = vcmp.lt.s32.totalorder %v3208_v45, 0 }
 0x1b7   : > { %v2144_v32 = vadd.s32 4294967294, %v1679_v17  ;;  %v1045_v42 = vadd.s32 1, %v3372_v0  ;;  %vm979_vm6 = vcmp.eq.s32.totalorder %v977_v54, 0  ;;  %v1697_v37 = vsub.s32 4, %v3351_v9 }
 0x1b8   : > { %v1719_v49 = vshrl.u32 %v1718_v31, 23  ;;  %v524_v11 = vmul.f32 %v3097_v27, %v474_v57  ;;  %vm975_vm8 = vweird.f32 %v3125_v1  ;;  %v1042_v33 = vmul.u32 %v1035_v25, %v1026_v29 }
 0x1b9   : > { %vm2145_vm7 = vcmp.lt.s32.totalorder %v2144_v32, 0  ;;  %vm1044_vm9 = vc.u32 %v3378_v61, %v3371_v50  ;;  %v1667_v36 = vadd.s32 %v3310_v34, %v3319_v63  ;;  %vm982_vm10 = vcmp.eq.s32.totalorder %v977_v54, 2 }
 0x1ba   : > { %v1682_v38 = vsel %vm2145_vm7, 0, %v2144_v32  ;;  %v2146_v13 = vadd.s32 4294967169, %v1719_v49  ;;  %v1046_v4 = vsel %vm1044_vm9, %v1045_v42, %v3372_v0  ;;  %v1715_v27 = vand.u32 2147483647, %v3359_v5 }
 0x1bb   : > { %v1683_v40 = vsub.s32 32, %v1682_v38  ;;  %v1687_v30 = vsub.s32 4294967266, %v1682_v38  ;;  %v1047_v19 = vadd.s32 %v1046_v4, %v1042_v33  ;;  %v1684_v25 = vshll.u32 %v3364_v14, %v1682_v38 }
 0x1bc   : > { %v1725_v39 = vadd.s32 1, %v2146_v13  ;;  %v1698_v8 = vsel %vm1613_vm5, %v1697_v37, %v3351_v9  ;;  %v550_v44 = vadd.f32 %v537_v7, %v524_v11  ;;  %vm978_vm11 = vcmp.lt.s32.totalorder %v977_v54, 2 }
 0x1bd   : > { %v2373_v2 = vpop.eup %2372  ;;  %v1685_v59 = vshrl.u32 %v1667_v36, %v1683_v40  ;;  %v1688_v55 = vadd.s32 127, %v1687_v30  ;;  %v1048_v18 = vadd.s32 536870912, %v1047_v19  ;;  %v1700_v14 = vsel %vm3384_vm4, 0, %v1698_v8 }
 0x1be   : > { %v2375_v34 = vpop.eup %2374  ;;  %v983_v63 = vxor.u32 2147483648, %v2373_v2  ;;  %vm1726_vm12 = vcmp.gt.s32.totalorder %v1725_v39, 0  ;;  %v1722_v60 = vand.u32 8388607, %v1715_v27  ;;  %v3413_v21 = vmul.f32 30.0, %v550_v44 }
 0x1bf   : > { %v980_v3 = vxor.u32 2147483648, %v2375_v34  ;;  %v1686_v48 = vor.u32 %v1685_v59, %v1684_v25  ;;  %v1689_v6 = vshll.u32 %v1688_v55, 23  ;;  %v1727_v12 = vsel %vm1726_vm12, %v1725_v39, 0 }
 0x1c0   : > { %v984_v10 = vsel %vm982_vm10, %v983_v63, %v2375_v34  ;;  %v3407_v58 = vshrl.u32 %v1048_v18, 30  ;;  %v1729_v53 = vand.u32 31, %v1727_v12  ;;  %v3417_v51 = vadd.s32 3, %v1700_v14 }
 0x1c1   : > { %v981_v9 = vsel %vm979_vm6, %v2373_v2, %v980_v3  ;;  %v1690_v52 = vor.u32 4788187, %v1689_v6  ;;  %v1693_v57 = vcvt.s32.f32 %v1686_v48  ;;  %v1723_v49 = vor.u32 8388608, %v1722_v60 }
 0x1c2   : > { %v985_v23 = vsel %vm978_vm11, %v981_v9, %v984_v10  ;;  %v1050_v62 = vshll.u32 %v3407_v58, 30  ;;  %v1730_v41 = vsub.s32 32, %v1729_v53  ;;  %v1732_v31 = vshll.u32 %v2483_v16, %v1729_v53 }
 0x1c3   : > { %v986_v0 = vsel %vm975_vm8, nan, %v985_v23  ;;  %v1691_v17 = vand.u32 2147483647, %v1690_v52  ;;  %v1735_v29 = vshll.u32 %v2484_v22, %v1729_v53  ;;  %v1738_v1 = vshll.u32 %v2485_v24, %v1729_v53 }
 0x1c4   : > { %1926 = vst [vmem:[%s2985_s14 + $0x18] sm:$0xff] %v986_v0  ;;  %v3420_v54 = vsub.s32 %v1047_v19, %v1050_v62  ;;  %v1733_v32 = vshrl.u32 %v2484_v22, %v1730_v41  ;;  %v1736_v37 = vshrl.u32 %v2485_v24, %v1730_v41  ;;  %v1043_v11 = vadd.s32 %v3371_v50, %v3378_v61 }
 0x1c5   : > { %v1694_v42 = vmul.f32 %v1693_v57, %v1691_v17  ;;  %v1739_v33 = vshrl.u32 %v2486_v26, %v1730_v41  ;;  %v1094_v13 = vand.u32 2139095040, %v3413_v21  ;;  %v1728_v40 = vshrl.u32 %v1727_v12, 5 }
 0x1c6   : > { %v1053_v38 = vsub.s32 0, %v3420_v54  ;;  %v1741_v30 = vshll.u32 %v2486_v26, %v1729_v53  ;;  %v1742_v4 = vshrl.u32 %v2487_v28, %v1730_v41  ;;  %v1734_v19 = vor.u32 %v1733_v32, %v1732_v31 }
 0x1c7   : > { %v1695_v36 = vxor.u32 2147483648, %v1694_v42  ;;  %v1737_v39 = vor.u32 %v1736_v37, %v1735_v29  ;;  %v1744_v2 = vshll.u32 %v2487_v28, %v1729_v53  ;;  %v1740_v61 = vor.u32 %v1739_v33, %v1738_v1 }
 0x1c8   : > { %v2119_v7 = vmin.u32 %v1053_v38, %v3420_v54  ;;  %v1743_v25 = vor.u32 %v1742_v4, %v1741_v30  ;;  %v1745_v59 = vshrl.u32 %v2488_v35, %v1730_v41  ;;  %v1763_v34 = vshll.u32 %v1723_v49, 8 }
 0x1c9   : > { %v1696_v50 = vsel %vm1613_vm5, %v1695_v36, %v1694_v42  ;;  %v1095_v63 = vshrl.u32 %v1094_v13, 23  ;;  %v1073_v18 = vsub.s32 4, %v3407_v58  ;;  %v1731_v44 = vshrl.u32 %v2483_v16, %v1730_v41 }
 0x1ca   : > { %v1699_v55 = vsel %vm3384_vm4, %v3208_v45, %v1696_v50  ;;  %v1055_v8 = vclz %v2119_v7  ;;  %v1746_v3 = vor.u32 %v1745_v59, %v1744_v2  ;;  %vm1747_vm13 = vcmp.lt.s32.totalorder %v1728_v40, 1 }
 0x1cb   : > { %2376 = vcosq.f32 %v1699_v55  ;;  %vm1750_vm14 = vcmp.lt.s32.totalorder %v1728_v40, 4  ;;  %vm1749_vm15 = vcmp.lt.s32.totalorder %v1728_v40, 3  ;;  %v1755_v12 = vsel %vm1747_vm13, %v1734_v19, %v1737_v39 }
 0x1cc   : > { %2378 = vsinq.f32 %v1699_v55  ;;  %v2120_v48 = vadd.s32 4294967294, %v1055_v8  ;;  %v1752_v6 = vsel %vm1750_vm14, %v1740_v61, 2102212464  ;;  %v1756_v10 = vsel %vm1750_vm14, %v1743_v25, 920167782 }
 0x1cd   : > { %vm1748_vm1 = vcmp.lt.s32.totalorder %v1728_v40, 2  ;;  %v1757_v46 = vsel %vm1749_vm15, %v1740_v61, %v1756_v10  ;;  %v1759_v14 = vsel %vm1747_vm13, %v1737_v39, %v1740_v61  ;;  %v1751_v9 = vsel %vm1747_vm13, %v1731_v44, %v1734_v19 }
 0x1ce   : > { %vm2121_vm0 = vcmp.lt.s32.totalorder %v2120_v48, 0  ;;  %v1758_v52 = vsel %vm1748_vm1, %v1755_v12, %v1757_v46  ;;  %v1760_v60 = vsel %vm1750_vm14, %v1746_v3, 1326507024  ;;  %v1753_v41 = vsel %vm1749_vm15, %v1737_v39, %v1752_v6 }
 0x1cf   : > { %v1058_v53 = vsel %vm2121_vm0, 0, %v2120_v48  ;;  %v1761_v0 = vsel %vm1749_vm15, %v1743_v25, %v1760_v60  ;;  %v3447_v31 = vmul.u32.u64.low %v1763_v34, %v1758_v52  ;;  %v3448_v32 = vmul.u32.u64.high %v1763_v34, %v1758_v52, %v3447_v31  ;;  %v544_v48 = vld [vmem:[%s2649_s10 + $0x60] sm:$0xff] }
 0x1d0   : > { %v1059_v23 = vsub.s32 32, %v1058_v53  ;;  %v1063_v62 = vsub.s32 4294967266, %v1058_v53  ;;  %v1060_v17 = vshll.u32 %v3420_v54, %v1058_v53  ;;  %v1762_v57 = vsel %vm1748_vm1, %v1759_v14, %v1761_v0 }
 0x1d1   : > { %v3451_v49 = vmul.u32.u64.low %v1763_v34, %v1762_v57  ;;  %v3452_v37 = vmul.u32.u64.high %v1763_v34, %v1762_v57, %v3451_v49  ;;  %vm989_vm2 = vcmp.lt.s32.totalorder %v3247_v43, 0  ;;  %v1754_v1 = vsel %vm1748_vm1, %v1751_v9, %v1753_v41 }
 0x1d2   : > { %v1061_v29 = vshrl.u32 %v1043_v11, %v1059_v23  ;;  %v1064_v42 = vadd.s32 127, %v1063_v62  ;;  %v1091_v38 = vand.u32 2147483647, %v3413_v21  ;;  %v2122_v33 = vadd.s32 4294967169, %v1095_v63 }
 0x1d3   : > { %v1074_v36 = vsel %vm989_vm2, %v1073_v18, %v3407_v58  ;;  %vm1703_vm3 = vweird.f32 %v3208_v45  ;;  %v1705_v11 = vand.u32 3, %v3417_v51  ;;  %v1773_v30 = vadd.s32 1, %v3448_v32 }
 0x1d4   : > { %v1062_v13 = vor.u32 %v1061_v29, %v1060_v17  ;;  %v1065_v54 = vshll.u32 %v1064_v42, 23  ;;  %v1101_v4 = vadd.s32 1, %v2122_v33  ;;  %v509_v40 = vadd.f32 %v3164_v47, %v3044_v15 }
 0x1d5   : > { %vm3467_vm4 = vcmp.le.f32.partialorder %v987_v20, 0.7853982  ;;  %v1770_v39 = vmul.u32 %v1763_v34, %v1754_v1  ;;  %vm1772_vm5 = vc.u32 %v3452_v37, %v3447_v31  ;;  %v1098_v2 = vand.u32 8388607, %v1091_v38  ;;  %v3481_v34 = vld [vmem:[%s3744_s3] ss:$0 sm:$0xff] }
 0x1d6   : > { %v1066_v19 = vor.u32 4788187, %v1065_v54  ;;  %v1076_v58 = vsel %vm3467_vm4, 0, %v1074_v36  ;;  %v1774_v51 = vsel %vm1772_vm5, %v1773_v30, %v3448_v32  ;;  %vm1102_vm6 = vcmp.gt.s32.totalorder %v1101_v4, 0 }
 0x1d7   : > { %v1069_v50 = vcvt.s32.f32 %v1062_v13  ;;  %v1775_v61 = vadd.s32 %v1774_v51, %v1770_v39  ;;  %v1103_v25 = vsel %vm1102_vm6, %v1101_v4, 0  ;;  %vm1706_vm7 = vcmp.lt.s32.totalorder %v1705_v11, 2 }
 0x1d8   : > { %v2377_v15 = vpop.eup %2376  ;;  %v1067_v20 = vand.u32 2147483647, %v1066_v19  ;;  %v1105_v8 = vand.u32 31, %v1103_v25  ;;  %v531_v63 = vmul.f32 %v3481_v34, %v509_v40  ;;  %vm1710_vm8 = vcmp.eq.s32.totalorder %v1705_v11, 2 }
 0x1d9   : > { %v2379_v59 = vpop.eup %2378  ;;  %v1711_v55 = vxor.u32 2147483648, %v2377_v15  ;;  %v1776_v3 = vadd.s32 536870912, %v1775_v61  ;;  %vm1707_vm9 = vcmp.eq.s32.totalorder %v1705_v11, 0  ;;  %v1080_v12 = vadd.s32 3, %v1076_v58 }
 0x1da   : > { %v1708_v18 = vxor.u32 2147483648, %v2379_v59  ;;  %v1070_v44 = vmul.f32 %v1069_v50, %v1067_v20  ;;  %v1106_v10 = vsub.s32 32, %v1105_v8  ;;  %v1099_v9 = vor.u32 8388608, %v1098_v2 }
 0x1db   : > { %v1712_v6 = vsel %vm1710_vm8, %v1711_v55, %v2379_v59  ;;  %v3485_v53 = vshrl.u32 %v1776_v3, 30  ;;  %v557_v62 = vadd.f32 %v544_v48, %v531_v63  ;;  %v1108_v57 = vshll.u32 %v2483_v16, %v1105_v8 }
 0x1dc   : > { %v1709_v46 = vsel %vm1707_vm9, %v2377_v15, %v1708_v18  ;;  %v1071_v14 = vxor.u32 2147483648, %v1070_v44  ;;  %v1109_v60 = vshrl.u32 %v2484_v22, %v1106_v10  ;;  %v1112_v23 = vshrl.u32 %v2485_v24, %v1106_v10 }
 0x1dd   : > { %v1713_v52 = vsel %vm1706_vm7, %v1709_v46, %v1712_v6  ;;  %v1778_v17 = vshll.u32 %v3485_v53, 30  ;;  %v1104_v29 = vshrl.u32 %v1103_v25, 5  ;;  %v1111_v42 = vshll.u32 %v2484_v22, %v1105_v8 }
 0x1de   : > { %v1714_v41 = vsel %vm1703_vm3, nan, %v1713_v52  ;;  %v1072_v0 = vsel %vm989_vm2, %v1071_v14, %v1070_v44  ;;  %v1115_v49 = vshrl.u32 %v2486_v26, %v1106_v10  ;;  %v1110_v1 = vor.u32 %v1109_v60, %v1108_v57 }
 0x1df   : > { %1933 = vst [vmem:[%s2985_s14 + $0x50] sm:$0xff] %v1714_v41  ;;  %v1075_v32 = vsel %vm3467_vm4, %v3247_v43, %v1072_v0  ;;  %v3502_v45 = vsub.s32 %v1775_v61, %v1778_v17  ;;  %v1114_v33 = vshll.u32 %v2485_v24, %v1105_v8  ;;  %v1113_v13 = vor.u32 %v1112_v23, %v1111_v42 }
 0x1e0   : > { %2380 = vcosq.f32 %v1075_v32  ;;  %v1117_v54 = vshll.u32 %v2486_v26, %v1105_v8  ;;  %v1118_v36 = vshrl.u32 %v2487_v28, %v1106_v10  ;;  %v1120_v4 = vshll.u32 %v2487_v28, %v1105_v8 }
 0x1e1   : > { %2382 = vsinq.f32 %v1075_v32  ;;  %v1781_v11 = vsub.s32 0, %v3502_v45  ;;  %v1116_v30 = vor.u32 %v1115_v49, %v1114_v33  ;;  %v1121_v40 = vshrl.u32 %v2488_v35, %v1106_v10 }
 0x1e2   : > { %v3510_v7 = vand.u32 3, %v1080_v12  ;;  %v1119_v19 = vor.u32 %v1118_v36, %v1117_v54  ;;  %v479_v39 = vadd.f32 %v3164_v47, %v3149_v56  ;;  %vm1123_vm10 = vcmp.lt.s32.totalorder %v1104_v29, 1 }
 0x1e3   : > { %v2147_v58 = vmin.u32 %v1781_v11, %v3502_v45  ;;  %v1122_v51 = vor.u32 %v1121_v40, %v1120_v4  ;;  %vm1126_vm12 = vcmp.lt.s32.totalorder %v1104_v29, 4  ;;  %v1131_v2 = vsel %vm1123_vm10, %v1110_v1, %v1113_v13 }
 0x1e4   : > { %v1132_v15 = vsel %vm1126_vm12, %v1119_v19, 920167782  ;;  %v1139_v20 = vshll.u32 %v1099_v9, 8  ;;  %v3515_v50 = vmul.f32 30.0, %v557_v62  ;;  %v1107_v25 = vshrl.u32 %v2483_v16, %v1106_v10 }
 0x1e5   : > { %v1783_v61 = vclz %v2147_v58  ;;  %vm1125_vm11 = vcmp.lt.s32.totalorder %v1104_v29, 3  ;;  %v1128_v59 = vsel %vm1126_vm12, %v1116_v30, 2102212464  ;;  %vm1124_vm13 = vcmp.lt.s32.totalorder %v1104_v29, 2 }
 0x1e6   : > { %v1133_v55 = vsel %vm1125_vm11, %v1116_v30, %v1132_v15  ;;  %v1135_v8 = vsel %vm1123_vm10, %v1113_v13, %v1116_v30  ;;  %v1136_v63 = vsel %vm1126_vm12, %v1122_v51, 1326507024  ;;  %v1127_v47 = vsel %vm1123_vm10, %v1107_v25, %v1110_v1  ;;  %v538_v30 = vld [vmem:[%s2649_s10 + $0x30] sm:$0xff] }
 0x1e7   : > { %v2148_v56 = vadd.s32 4294967294, %v1783_v61  ;;  %v1134_v18 = vsel %vm1124_vm13, %v1131_v2, %v1133_v55  ;;  %v1137_v44 = vsel %vm1125_vm11, %v1119_v19, %v1136_v63  ;;  %vm1717_vm14 = vcmp.lt.s32.totalorder %v3359_v5, 0 }
 0x1e8   : > { %v1129_v3 = vsel %vm1125_vm11, %v1113_v13, %v1128_v59  ;;  %v1138_v48 = vsel %vm1124_vm13, %v1135_v8, %v1137_v44  ;;  %v3521_v6 = vmul.u32.u64.low %v1139_v20, %v1134_v18  ;;  %v3522_v12 = vmul.u32.u64.high %v1139_v20, %v1134_v18, %v3521_v6 }
 0x1e9   : > { %vm1082_vm15 = vcmp.lt.s32.totalorder %v3510_v7, 2  ;;  %vm2149_vm0 = vcmp.lt.s32.totalorder %v2148_v56, 0  ;;  %v3526_v10 = vmul.u32.u64.low %v1139_v20, %v1138_v48  ;;  %v3527_v46 = vmul.u32.u64.high %v1139_v20, %v1138_v48, %v3526_v10 }
 0x1ea   : > { %vm1083_vm1 = vcmp.eq.s32.totalorder %v3510_v7, 0  ;;  %vm1086_vm2 = vcmp.eq.s32.totalorder %v3510_v7, 2  ;;  %v1786_v14 = vsel %vm2149_vm0, 0, %v2148_v56  ;;  %v1822_v9 = vand.u32 2139095040, %v3515_v50 }
 0x1eb   : > { %v1771_v52 = vadd.s32 %v3447_v31, %v3452_v37  ;;  %v1787_v60 = vsub.s32 32, %v1786_v14  ;;  %v1791_v23 = vsub.s32 4294967266, %v1786_v14  ;;  %v1130_v62 = vsel %vm1124_vm13, %v1127_v47, %v1129_v3 }
 0x1ec   : > { %v1801_v0 = vsub.s32 4, %v3485_v53  ;;  %v1149_v17 = vadd.s32 1, %v3522_v12  ;;  %v1823_v57 = vshrl.u32 %v1822_v9, 23  ;;  %v525_v32 = vmul.f32 %v3481_v34, %v479_v39 }
 0x1ed   : > { %v2381_v41 = vpop.eup %2380  ;;  %v1788_v1 = vshll.u32 %v3502_v45, %v1786_v14  ;;  %v1789_v33 = vshrl.u32 %v1771_v52, %v1787_v60  ;;  %v1792_v13 = vadd.s32 127, %v1791_v23  ;;  %v1146_v37 = vmul.u32 %v1139_v20, %v1130_v62 }
 0x1ee   : > { %v2383_v42 = vpop.eup %2382  ;;  %v1087_v49 = vxor.u32 2147483648, %v2381_v41  ;;  %vm1148_vm3 = vc.u32 %v3527_v46, %v3521_v6  ;;  %v2150_v29 = vadd.s32 4294967169, %v1823_v57  ;;  %v1819_v40 = vand.u32 2147483647, %v3515_v50 }
 0x1ef   : > { %v1084_v31 = vxor.u32 2147483648, %v2383_v42  ;;  %v1790_v36 = vor.u32 %v1789_v33, %v1788_v1  ;;  %v1793_v11 = vshll.u32 %v1792_v13, 23  ;;  %v1150_v34 = vsel %vm1148_vm3, %v1149_v17, %v3522_v12 }
 0x1f0   : > { %v1088_v54 = vsel %vm1086_vm2, %v1087_v49, %v2383_v42  ;;  %v1151_v4 = vadd.s32 %v1150_v34, %v1146_v37  ;;  %v1829_v19 = vadd.s32 1, %v2150_v29  ;;  %vm1079_vm4 = vweird.f32 %v3247_v43 }
 0x1f1   : > { %v1085_v45 = vsel %vm1083_vm1, %v2381_v41, %v1084_v31  ;;  %v1794_v58 = vor.u32 4788187, %v1793_v11  ;;  %v1802_v51 = vsel %vm1717_vm14, %v1801_v0, %v3485_v53  ;;  %v551_v20 = vadd.f32 %v538_v30, %v525_v32 }
 0x1f2   : > { %v1089_v39 = vsel %vm1082_vm15, %v1085_v45, %v1088_v54  ;;  %v1152_v15 = vadd.s32 536870912, %v1151_v4  ;;  %vm1830_vm5 = vcmp.gt.s32.totalorder %v1829_v19, 0  ;;  %vm3557_vm6 = vcmp.le.f32.partialorder %v1715_v27, 0.7853982 }
 0x1f3   : > { %v1090_v2 = vsel %vm1079_vm4, nan, %v1089_v39  ;;  %v1795_v43 = vand.u32 2147483647, %v1794_v58  ;;  %v1797_v25 = vcvt.s32.f32 %v1790_v36  ;;  %v1831_v7 = vsel %vm1830_vm5, %v1829_v19, 0 }
 0x1f4   : > { %1927 = vst [vmem:[%s2985_s14 + $0x20] sm:$0xff] %v1090_v2  ;;  %v1804_v59 = vsel %vm3557_vm6, 0, %v1802_v51  ;;  %v3563_v55 = vshrl.u32 %v1152_v15, 30  ;;  %v1826_v53 = vand.u32 8388607, %v1819_v40  ;;  %v1833_v8 = vand.u32 31, %v1831_v7 }
 0x1f5   : > { %v1798_v63 = vmul.f32 %v1797_v25, %v1795_v43  ;;  %v3568_v27 = vmul.f32 30.0, %v551_v20  ;;  %v1808_v44 = vadd.s32 3, %v1804_v59  ;;  %v1832_v17 = vshrl.u32 %v1831_v7, 5 }
 0x1f6   : > { %v1154_v56 = vshll.u32 %v3563_v55, 30  ;;  %v1834_v47 = vsub.s32 32, %v1833_v8  ;;  %v1836_v3 = vshll.u32 %v2483_v16, %v1833_v8  ;;  %v1839_v48 = vshll.u32 %v2484_v22, %v1833_v8 }
 0x1f7   : > { %v1799_v18 = vxor.u32 2147483648, %v1798_v63  ;;  %v1827_v10 = vor.u32 8388608, %v1826_v53  ;;  %v1842_v9 = vshll.u32 %v2485_v24, %v1833_v8  ;;  %v1845_v62 = vshll.u32 %v2486_v26, %v1833_v8 }
 0x1f8   : > { %v3572_v12 = vsub.s32 %v1151_v4, %v1154_v56  ;;  %v1837_v14 = vshrl.u32 %v2484_v22, %v1834_v47  ;;  %v1840_v60 = vshrl.u32 %v2485_v24, %v1834_v47  ;;  %v1843_v23 = vshrl.u32 %v2486_v26, %v1834_v47 }
 0x1f9   : > { %v1800_v52 = vsel %vm1717_vm14, %v1799_v18, %v1798_v63  ;;  %v1198_v57 = vand.u32 2139095040, %v3568_v27  ;;  %v1846_v49 = vshrl.u32 %v2487_v28, %v1834_v47  ;;  %v1848_v13 = vshll.u32 %v2487_v28, %v1833_v8 }
 0x1fa   : > { %v1803_v41 = vsel %vm3557_vm6, %v3359_v5, %v1800_v52  ;;  %v1157_v0 = vsub.s32 0, %v3572_v12  ;;  %v1838_v32 = vor.u32 %v1837_v14, %v1836_v3  ;;  %v1841_v42 = vor.u32 %v1840_v60, %v1839_v48 }
 0x1fb   : > { %2384 = vcosq.f32 %v1803_v41  ;;  %v1844_v33 = vor.u32 %v1843_v23, %v1842_v9  ;;  %v3589_v31 = vand.u32 3, %v1808_v44  ;;  %v1835_v37 = vshrl.u32 %v2483_v16, %v1834_v47 }
 0x1fc   : > { %2386 = vsinq.f32 %v1803_v41  ;;  %v2123_v1 = vmin.u32 %v1157_v0, %v3572_v12  ;;  %v1847_v29 = vor.u32 %v1846_v49, %v1845_v62  ;;  %v1849_v54 = vshrl.u32 %v2488_v35, %v1834_v47 }
 0x1fd   : > { %vm1851_vm7 = vcmp.lt.s32.totalorder %v1832_v17, 1  ;;  %v1867_v11 = vshll.u32 %v1827_v10, 8  ;;  %v1199_v34 = vshrl.u32 %v1198_v57, 23  ;;  %vm1852_vm8 = vcmp.lt.s32.totalorder %v1832_v17, 2 }
 0x1fe   : > { %v1159_v36 = vclz %v2123_v1  ;;  %v1850_v30 = vor.u32 %v1849_v54, %v1848_v13  ;;  %vm1853_vm9 = vcmp.lt.s32.totalorder %v1832_v17, 3  ;;  %vm1854_vm10 = vcmp.lt.s32.totalorder %v1832_v17, 4 }
 0x1ff   : > { %v1856_v4 = vsel %vm1854_vm10, %v1844_v33, 2102212464  ;;  %v1859_v19 = vsel %vm1851_vm7, %v1838_v32, %v1841_v42  ;;  %v1860_v39 = vsel %vm1854_vm10, %v1847_v29, 920167782  ;;  %v1855_v58 = vsel %vm1851_vm7, %v1835_v37, %v1838_v32 }
 0x200   : > { %v2124_v45 = vadd.s32 4294967294, %v1159_v36  ;;  %v1861_v51 = vsel %vm1853_vm9, %v1844_v33, %v1860_v39  ;;  %v1863_v2 = vsel %vm1851_vm7, %v1841_v42, %v1844_v33  ;;  %v1864_v15 = vsel %vm1854_vm10, %v1850_v30, 1326507024 }
 0x201   : > { %v1857_v20 = vsel %vm1853_vm9, %v1841_v42, %v1856_v4  ;;  %v1862_v61 = vsel %vm1852_vm8, %v1859_v19, %v1861_v51  ;;  %v1865_v43 = vsel %vm1853_vm9, %v1847_v29, %v1864_v15  ;;  %vm1093_vm11 = vcmp.lt.s32.totalorder %v3413_v21, 0 }
 0x202   : > { %vm2125_vm12 = vcmp.lt.s32.totalorder %v2124_v45, 0  ;;  %v1866_v7 = vsel %vm1852_vm8, %v1863_v2, %v1865_v43  ;;  %v3595_v59 = vmul.u32.u64.low %v1867_v11, %v1862_v61  ;;  %v3596_v53 = vmul.u32.u64.high %v1867_v11, %v1862_v61, %v3595_v59 }
 0x203   : > { %v1162_v25 = vsel %vm2125_vm12, 0, %v2124_v45  ;;  %v1147_v8 = vadd.s32 %v3521_v6, %v3527_v46  ;;  %v3602_v47 = vmul.u32.u64.low %v1867_v11, %v1866_v7  ;;  %v3603_v18 = vmul.u32.u64.high %v1867_v11, %v1866_v7, %v3602_v47 }
 0x204   : > { %v1163_v63 = vsub.s32 32, %v1162_v25  ;;  %v1167_v56 = vsub.s32 4294967266, %v1162_v25  ;;  %v1195_v44 = vand.u32 2147483647, %v3568_v27  ;;  %v2126_v3 = vadd.s32 4294967169, %v1199_v34 }
 0x205   : > { %v1164_v48 = vshll.u32 %v3572_v12, %v1162_v25  ;;  %v1858_v9 = vsel %vm1852_vm8, %v1855_v58, %v1857_v20  ;;  %vm1810_vm13 = vcmp.lt.s32.totalorder %v3589_v31, 2  ;;  %v1177_v52 = vsub.s32 4, %v3563_v55 }
 0x206   : > { %v1165_v10 = vshrl.u32 %v1147_v8, %v1163_v63  ;;  %v1168_v14 = vadd.s32 127, %v1167_v56  ;;  %v1877_v6 = vadd.s32 1, %v3596_v53  ;;  %v1205_v46 = vadd.s32 1, %v2126_v3 }
 0x207   : > { %vm1811_vm14 = vcmp.eq.s32.totalorder %v3589_v31, 0  ;;  %vm1814_vm15 = vcmp.eq.s32.totalorder %v3589_v31, 2  ;;  %v1874_v0 = vmul.u32 %v1867_v11, %v1858_v9  ;;  %vm1876_vm0 = vc.u32 %v3603_v18, %v3595_v59 }
 0x208   : > { %v2385_v60 = vpop.eup %2384  ;;  %v1166_v23 = vor.u32 %v1165_v10, %v1164_v48  ;;  %v1169_v62 = vshll.u32 %v1168_v14, 23  ;;  %vm1206_vm1 = vcmp.gt.s32.totalorder %v1205_v46, 0  ;;  %v1878_v32 = vsel %vm1876_vm0, %v1877_v6, %v3596_v53 }
 0x209   : > { %v2387_v41 = vpop.eup %2386  ;;  %v1815_v12 = vxor.u32 2147483648, %v2385_v60  ;;  %v1202_v42 = vand.u32 8388607, %v1195_v44  ;;  %v1178_v1 = vsel %vm1093_vm11, %v1177_v52, %v3563_v55  ;;  %v1879_v33 = vadd.s32 %v1878_v32, %v1874_v0 }
 0x20a   : > { %v1812_v17 = vxor.u32 2147483648, %v2387_v41  ;;  %v1170_v57 = vor.u32 4788187, %v1169_v62  ;;  %v1207_v13 = vsel %vm1206_vm1, %v1205_v46, 0  ;;  %v1173_v54 = vcvt.s32.f32 %v1166_v23 }
 0x20b   : > { %v1816_v49 = vsel %vm1814_vm15, %v1815_v12, %v2387_v41  ;;  %v1209_v36 = vand.u32 31, %v1207_v13  ;;  %vm1807_vm2 = vweird.f32 %v3359_v5  ;;  %v1880_v34 = vadd.s32 536870912, %v1879_v33 }
 0x20c   : > { %v1813_v37 = vsel %vm1811_vm14, %v2385_v60, %v1812_v17  ;;  %v1171_v29 = vand.u32 2147483647, %v1170_v57  ;;  %vm3628_vm3 = vcmp.le.f32.partialorder %v1091_v38, 0.7853982  ;;  %v1203_v5 = vor.u32 8388608, %v1202_v42 }
 0x20d   : > { %v1817_v11 = vsel %vm1810_vm13, %v1813_v37, %v1816_v49  ;;  %v1210_v4 = vsub.s32 32, %v1209_v36  ;;  %v1180_v19 = vsel %vm3628_vm3, 0, %v1178_v1  ;;  %v3635_v39 = vshrl.u32 %v1880_v34, 30 }
 0x20e   : > { %v1818_v30 = vsel %vm1807_vm2, nan, %v1817_v11  ;;  %v1174_v55 = vmul.f32 %v1173_v54, %v1171_v29  ;;  %v1212_v31 = vshll.u32 %v2483_v16, %v1209_v36  ;;  %v1215_v2 = vshll.u32 %v2484_v22, %v1209_v36 }
 0x20f   : > { %1934 = vst [vmem:[%s2985_s14 + $0x58] sm:$0xff] %v1818_v30  ;;  %v1213_v51 = vshrl.u32 %v2484_v22, %v1210_v4  ;;  %v1216_v38 = vshrl.u32 %v2485_v24, %v1210_v4  ;;  %v1882_v15 = vshll.u32 %v3635_v39, 30  ;;  %v1218_v20 = vshll.u32 %v2485_v24, %v1209_v36 }
 0x210   : > { %v1175_v58 = vxor.u32 2147483648, %v1174_v55  ;;  %v1219_v61 = vshrl.u32 %v2486_v26, %v1210_v4  ;;  %v1222_v43 = vshrl.u32 %v2487_v28, %v1210_v4  ;;  %v1208_v7 = vshrl.u32 %v1207_v13, 5 }
 0x211   : > { %v1214_v53 = vor.u32 %v1213_v51, %v1212_v31  ;;  %v1221_v8 = vshll.u32 %v2486_v26, %v1209_v36  ;;  %v1883_v63 = vsub.s32 %v1879_v33, %v1882_v15  ;;  %v1217_v56 = vor.u32 %v1216_v38, %v1215_v2 }
 0x212   : > { %v1176_v25 = vsel %vm1093_vm11, %v1175_v58, %v1174_v55  ;;  %v1220_v47 = vor.u32 %v1219_v61, %v1218_v20  ;;  %v1224_v3 = vshll.u32 %v2487_v28, %v1209_v36  ;;  %v1225_v48 = vshrl.u32 %v2488_v35, %v1210_v4 }
 0x213   : > { %v1179_v22 = vsel %vm3628_vm3, %v3413_v21, %v1176_v25  ;;  %v1223_v24 = vor.u32 %v1222_v43, %v1221_v8  ;;  %v1885_v10 = vsub.s32 0, %v1883_v63  ;;  %vm1230_vm4 = vcmp.lt.s32.totalorder %v1208_v7, 4 }
 0x214   : > { %2388 = vcosq.f32 %v1179_v22  ;;  %v1226_v14 = vor.u32 %v1225_v48, %v1224_v3  ;;  %v1184_v9 = vadd.s32 3, %v1180_v19  ;;  %vm1227_vm5 = vcmp.lt.s32.totalorder %v1208_v7, 1 }
 0x215   : > { %2390 = vsinq.f32 %v1179_v22  ;;  %v2151_v52 = vmin.u32 %v1885_v10, %v1883_v63  ;;  %v1232_v26 = vsel %vm1230_vm4, %v1220_v47, 2102212464  ;;  %v1211_v6 = vshrl.u32 %v2483_v16, %v1210_v4 }
 0x216   : > { %v1235_v46 = vsel %vm1227_vm5, %v1214_v53, %v1217_v56  ;;  %v1236_v60 = vsel %vm1230_vm4, %v1223_v24, 920167782  ;;  %v1243_v23 = vshll.u32 %v1203_v5, 8  ;;  %vm1228_vm6 = vcmp.lt.s32.totalorder %v1208_v7, 2 }
 0x217   : > { %v1887_v62 = vclz %v2151_v52  ;;  %vm1229_vm7 = vcmp.lt.s32.totalorder %v1208_v7, 3  ;;  %v1239_v28 = vsel %vm1227_vm5, %v1217_v56, %v1220_v47  ;;  %v1231_v35 = vsel %vm1227_vm5, %v1211_v6, %v1214_v53 }
 0x218   : > { %v1233_v41 = vsel %vm1229_vm7, %v1217_v56, %v1232_v26  ;;  %v1237_v12 = vsel %vm1229_vm7, %v1220_v47, %v1236_v60  ;;  %v1240_v0 = vsel %vm1230_vm4, %v1226_v14, 1326507024  ;;  %v1185_v37 = vand.u32 3, %v1184_v9 }
 0x219   : > { %v2152_v17 = vadd.s32 4294967294, %v1887_v62  ;;  %v1238_v57 = vsel %vm1228_vm6, %v1235_v46, %v1237_v12  ;;  %v1241_v32 = vsel %vm1229_vm7, %v1223_v24, %v1240_v0  ;;  %v1234_v16 = vsel %vm1228_vm6, %v1231_v35, %v1233_v41 }
 0x21a   : > { %v1242_v42 = vsel %vm1228_vm6, %v1239_v28, %v1241_v32  ;;  %v3657_v49 = vmul.u32.u64.low %v1243_v23, %v1238_v57  ;;  %v3658_v1 = vmul.u32.u64.high %v1243_v23, %v1238_v57, %v3657_v49  ;;  %v1875_v54 = vadd.s32 %v3595_v59, %v3603_v18 }
 0x21b   : > { %vm2153_vm8 = vcmp.lt.s32.totalorder %v2152_v17, 0  ;;  %v3660_v33 = vmul.u32.u64.low %v1243_v23, %v1242_v42  ;;  %v3661_v13 = vmul.u32.u64.high %v1243_v23, %v1242_v42, %v3660_v33  ;;  %v1250_v34 = vmul.u32 %v1243_v23, %v1234_v16 }
 0x21c   : > { %v1890_v29 = vsel %vm2153_vm8, 0, %v2152_v17  ;;  %v1253_v30 = vadd.s32 1, %v3658_v1  ;;  %vm1190_vm10 = vcmp.eq.s32.totalorder %v1185_v37, 2  ;;  %vm1187_vm12 = vcmp.eq.s32.totalorder %v1185_v37, 0 }
 0x21d   : > { %v1891_v36 = vsub.s32 32, %v1890_v29  ;;  %v1895_v11 = vsub.s32 4294967266, %v1890_v29  ;;  %v1892_v55 = vshll.u32 %v1883_v63, %v1890_v29  ;;  %vm1252_vm9 = vc.u32 %v3661_v13, %v3657_v49 }
 0x21e   : > { %v1254_v58 = vsel %vm1252_vm9, %v1253_v30, %v3658_v1  ;;  %vm1186_vm11 = vcmp.lt.s32.totalorder %v1185_v37, 2  ;;  %vm1183_vm13 = vweird.f32 %v3413_v21  ;;  %vm1821_vm14 = vcmp.lt.s32.totalorder %v3515_v50, 0 }
 0x21f   : > { %v1893_v4 = vshrl.u32 %v1875_v54, %v1891_v36  ;;  %v1896_v19 = vadd.s32 127, %v1895_v11  ;;  %v1255_v18 = vadd.s32 %v1254_v58, %v1250_v34  ;;  %v1905_v24 = vsub.s32 4, %v3635_v39 }
 0x220   : > { %vm1820_vm15 = vcmp.le.f32.partialorder %v1819_v40, 0.7853982  ;;  %v1251_v60 = vadd.s32 %v3657_v49, %v3661_v13  ;;  %vm1911_vm4 = vweird.f32 %v3515_v50  ;;  %vm1197_vm5 = vcmp.lt.s32.totalorder %v3568_v27, 0 }
 0x221   : > { %v2389_v45 = vpop.eup %2388  ;;  %v1894_v2 = vor.u32 %v1893_v4, %v1892_v55  ;;  %v1897_v59 = vshll.u32 %v1896_v19, 23  ;;  %v1256_v61 = vadd.s32 536870912, %v1255_v18  ;;  %v1906_v14 = vsel %vm1821_vm14, %v1905_v24, %v3635_v39 }
 0x222   : > { %v2391_v5 = vpop.eup %2390  ;;  %v1191_v31 = vxor.u32 2147483648, %v2389_v45  ;;  %v1908_v52 = vsel %vm1820_vm15, 0, %v1906_v14  ;;  %vm1196_vm6 = vcmp.le.f32.partialorder %v1195_v44, 0.7853982 }
 0x223   : > { %v1188_v51 = vxor.u32 2147483648, %v2391_v5  ;;  %v1898_v20 = vor.u32 4788187, %v1897_v59  ;;  %v1901_v53 = vcvt.s32.f32 %v1894_v2  ;;  %v1257_v8 = vshrl.u32 %v1256_v61, 30 }
 0x224   : > { %v1192_v38 = vsel %vm1190_vm10, %v1191_v31, %v2391_v5  ;;  %v1912_v6 = vadd.s32 3, %v1908_v52  ;;  %vm1287_vm10 = vweird.f32 %v3568_v27 }
 0x225   : > { %v1189_v15 = vsel %vm1187_vm12, %v2389_v45, %v1188_v51  ;;  %v1899_v7 = vand.u32 2147483647, %v1898_v20  ;;  %v1258_v63 = vshll.u32 %v1257_v8, 30  ;;  %v1281_v36 = vsub.s32 4, %v1257_v8 }
 0x226   : > { %v1193_v43 = vsel %vm1186_vm11, %v1189_v15, %v1192_v38  ;;  %v1913_v41 = vand.u32 3, %v1912_v6 }
 0x227   : > { %v1194_v25 = vsel %vm1183_vm13, nan, %v1193_v43  ;;  %v1902_v22 = vmul.f32 %v1901_v53, %v1899_v7  ;;  %v1259_v47 = vsub.s32 %v1255_v18, %v1258_v63  ;;  %v1282_v30 = vsel %vm1197_vm5, %v1281_v36, %v1257_v8 }
 0x228   : > { %1928 = vst [vmem:[%s2985_s14 + $0x28] sm:$0xff] %v1194_v25  ;;  %vm1918_vm1 = vcmp.eq.s32.totalorder %v1913_v41, 2  ;;  %vm1915_vm2 = vcmp.eq.s32.totalorder %v1913_v41, 0  ;;  %vm1914_vm3 = vcmp.lt.s32.totalorder %v1913_v41, 2 }
 0x229   : > { %v1903_v56 = vxor.u32 2147483648, %v1902_v22  ;;  %v1261_v48 = vsub.s32 0, %v1259_v47 }
 0x22b   : > { %v1904_v3 = vsel %vm1821_vm14, %v1903_v56, %v1902_v22  ;;  %v2127_v10 = vmin.u32 %v1261_v48, %v1259_v47 }
 0x22c   : > { %v1907_v21 = vsel %vm1820_vm15, %v3515_v50, %v1904_v3  ;;  %v1284_v50 = vsel %vm1196_vm6, 0, %v1282_v30 }
 0x22d   : > { %2392 = vcosq.f32 %v1907_v21  ;;  %v1263_v9 = vclz %v2127_v10  ;;  %v1288_v45 = vadd.s32 3, %v1284_v50 }
 0x22e   : > { %2394 = vsinq.f32 %v1907_v21 }
 0x22f   : > { %v2128_v26 = vadd.s32 4294967294, %v1263_v9  ;;  %v1289_v55 = vand.u32 3, %v1288_v45 }
 0x231   : > { %vm2129_vm0 = vcmp.lt.s32.totalorder %v2128_v26, 0  ;;  %vm1294_vm7 = vcmp.eq.s32.totalorder %v1289_v55, 2  ;;  %vm1291_vm8 = vcmp.eq.s32.totalorder %v1289_v55, 0  ;;  %vm1290_vm9 = vcmp.lt.s32.totalorder %v1289_v55, 2 }
 0x232   : > { %v1266_v46 = vsel %vm2129_vm0, 0, %v2128_v26 }
 0x233   : > { %v1267_v23 = vsub.s32 32, %v1266_v46  ;;  %v1271_v62 = vsub.s32 4294967266, %v1266_v46  ;;  %v1268_v40 = vshll.u32 %v1259_v47, %v1266_v46 }
 0x235   : > { %v1269_v28 = vshrl.u32 %v1251_v60, %v1267_v23  ;;  %v1272_v35 = vadd.s32 127, %v1271_v62 }
 0x237   : > { %v1270_v12 = vor.u32 %v1269_v28, %v1268_v40  ;;  %v1273_v0 = vshll.u32 %v1272_v35, 23 }
 0x239   : > { %v1274_v32 = vor.u32 4788187, %v1273_v0  ;;  %v1277_v33 = vcvt.s32.f32 %v1270_v12 }
 0x23a   : > { %v2393_v17 = vpop.eup %2392 }
 0x23b   : > { %v2395_v39 = vpop.eup %2394  ;;  %v1919_v57 = vxor.u32 2147483648, %v2393_v17  ;;  %v1275_v16 = vand.u32 2147483647, %v1274_v32 }
 0x23c   : > { %v1916_v42 = vxor.u32 2147483648, %v2395_v39 }
 0x23d   : > { %v1920_v1 = vsel %vm1918_vm1, %v1919_v57, %v2395_v39  ;;  %v1278_v37 = vmul.f32 %v1277_v33, %v1275_v16 }
 0x23e   : > { %v1917_v49 = vsel %vm1915_vm2, %v2393_v17, %v1916_v42 }
 0x23f   : > { %v1921_v13 = vsel %vm1914_vm3, %v1917_v49, %v1920_v1  ;;  %v1279_v54 = vxor.u32 2147483648, %v1278_v37 }
 0x240   : > { %v1922_v29 = vsel %vm1911_vm4, nan, %v1921_v13 }
 0x241   : > { %1935 = vst [vmem:[%s2985_s14 + $0x60] sm:$0xff] %v1922_v29  ;;  %v1280_v11 = vsel %vm1197_vm5, %v1279_v54, %v1278_v37 }
 0x242   : > { %v1283_v34 = vsel %vm1196_vm6, %v3568_v27, %v1280_v11 }
 0x243   : > { %2396 = vcosq.f32 %v1283_v34 }
 0x244   : > { %2398 = vsinq.f32 %v1283_v34 }
 0x250   : > { %v2397_v4 = vpop.eup %2396 }
 0x251   : > { %v2399_v19 = vpop.eup %2398  ;;  %v1295_v5 = vxor.u32 2147483648, %v2397_v4 }
 0x252   : > { %v1292_v31 = vxor.u32 2147483648, %v2399_v19 }
 0x253   : > { %v1296_v44 = vsel %vm1294_vm7, %v1295_v5, %v2399_v19 }
 0x254   : > { %v1293_v58 = vsel %vm1291_vm8, %v2397_v4, %v1292_v31 }
 0x255   : > { %v1297_v51 = vsel %vm1290_vm9, %v1293_v58, %v1296_v44 }
 0x256   : > { %v1298_v2 = vsel %vm1287_vm10, nan, %v1297_v51 }
 0x257   : > { %1929 = vst [vmem:[%s2985_s14 + $0x30] sm:$0xff] %v1298_v2 }
 0x258   : > { %2416 = shalt.err (!%p2413_p5)
}
 0x259   : > { %s2417_s9 = scalar_lea.hbm %s3691_s21, 1664  ;;  %s2421_s24 = scalar_lea.hbm %s3746_s5, 3328 }
 0x25a   : > { %p2418_p6 = scmp.ne.s32.totalorder %s3691_s21, %s2417_s9  ;;  %p2422_p10 = scmp.lt.s32.totalorder %s3691_s21, %s3746_s5 }
 0x25b   : > { %p2423_p11 = scmp.lt.s32.totalorder %s2421_s24, %s2417_s9 }
 0x25c   : > { %p2419_p7 = pnand %p2418_p6, %p2562_p4 }
 0x25d   : > { %p2424_p12 = por %p2423_p11, %p2422_p10 }
 0x25e   : > { %p2420_p9 = pneg %p2419_p7 }
 0x260   : > { %p2425_p13 = pnand %p2424_p12, %p2420_p9 }
 0x262   : > { %2428 = shalt.err (!%p2425_p13)
}
 0x263   : > { %s2490_s29 = smov 128   ;;  %s2491_s8 = smov 8  }
 0x264   : > { %2283 = dma.vmem_to_hbm [thread:$0]  (%p2562_p4), %s3685_s7, 1664, %s3691_s21, %s3696_s11, %s2490_s29, %s2490_s29, %s2491_s8  }
 0x265 PF: > { %p2289_p0 = scmp.ge.s32.totalorder %s2479_s23, 2  ;;  %s1966_s10 = sand.u32 1, %s2459_s18  }
 0x266   : > { %s1967_s12 = scalar_lea.sflag [#allocation3], %s1966_s10 }
 0x267   : > { %p2286_p1 = pnand %p2289_p0, %p2569_p8 }
 0x269   : > { %p2287_p2 = pneg %p2286_p1 }
 0x26b   : > { %2454 = dma.done.wait (%p2287_p2), %s1967_s12, 1664  }
 0x26c   : > { %2456 = vsyncadd (%p2287_p2), %s1967_s12, 4294965632  ;;  %s18_s23 = sadd.s32 1, %s2479_s23   ;;  %s3771_s18 = smov %s2463_s19 }
 0x26d   : > { %p15_p3 = scmp.ge.s32.totalorder %s18_s23, 4   ;;  %s3772_s19 = smov %s2467_s20 }
 0x26e   : > { %s3773_s20 = smov %s2575_s6  ;;  %s3774_s21 = smov %s2475_s22 }
 0x26f   : > { %s3775_s22 = smov %s3777_s26  ;;  %17 = sbr.rel (!%p15_p3) target bundleno = 4 (0x4), region = 87 }
 0x274   :  { %1972 = vsyncpa [#allocation3], 1 }
 0x275   :  { %1974 = vsyncpa [#allocation3 + $0x1], 1 }

</bundles_post_ra>
